<compile_context>
chip_gen: v7x
topology: tpu7x:2x2x1
jax: 0.10.0
libtpu: 0.0.40
codegen_flags: <defaults>
</compile_context>

<pallas_src>
import jax
import jax.numpy as jnp
from jax import lax
from jax.experimental import pallas as pl
from jax.experimental.pallas import tpu as pltpu

MID = 32          # mid_channel in the PyTorch module
KSIZE = 3         # kernel_size (module hard-codes padding=1 -> 'same' for k=3)
PAD = 1
POOL = 2          # pool_size (kernel == stride in the module)
LANES = 128
PACK = LANES // MID   # 4 sequences packed side-by-side on the lane axis


def residual_stack_kernel(x_ref, mprev_ref, mnext_ref, w1_ref, w_ref,
                          o_ref, buf_ref):
    """One grid step: `gps` groups of PACK lane-packed sequences.

    x_ref    : (rows, PACK*Cin)      packed input, rows = gps * L
    mprev_ref: (rows, 128) f32       0/1: tap l-1 valid (position != 0)
    mnext_ref: (rows, 128) f32       0/1: tap l+1 valid (position != L-1)
    w1_ref   : (PACK*Cin, 128)       block-diagonal 1x1 conv weight
    w_ref    : (4, KSIZE, 128, 128)  block-diagonal per-tap weights of conv2..5
    o_ref    : (rows // POOL, 128)   lane-dense pooled output
    buf_ref  : (rows, 128) VMEM      scratch for the stride-2 pool de-interleave
    """
    rows = x_ref.shape[0]
    m_prev = mprev_ref[...]
    m_next = mnext_ref[...]

    def conv3(h, ci):
        # 'same' 3-tap conv: roll (XLU) + mask (VPU), 3 accumulated MXU matmuls.
        prev = m_prev * pltpu.roll(h, shift=1, axis=0)
        nxt = m_next * pltpu.roll(h, shift=rows - 1, axis=0)
        acc = jnp.dot(prev, w_ref[ci, 0], preferred_element_type=jnp.float32)
        acc = acc + jnp.dot(h, w_ref[ci, 1], preferred_element_type=jnp.float32)
        acc = acc + jnp.dot(nxt, w_ref[ci, 2], preferred_element_type=jnp.float32)
        return acc

    # conv1: 1x1 conv == channel matmul (block-diag across the PACK sequences).
    h = jnp.dot(x_ref[...], w1_ref[...], preferred_element_type=jnp.float32)

    sc = h
    h = jax.nn.relu(conv3(h, 0))
    h = jax.nn.relu(conv3(h, 1) + sc)
    sc = h
    h = jax.nn.relu(conv3(h, 2))
    h = jax.nn.relu(conv3(h, 3) + sc)

    # MaxPool1d(POOL, POOL): de-interleave pooling windows with sublane-strided
    # reads of a VMEM scratch (the proven-safe stride-2 row selection), then
    # store the already lane-dense (rows//POOL, 128) result (no transpose).
    buf_ref[...] = h
    half = rows // POOL
    pooled = buf_ref[pl.ds(0, half, stride=POOL), :]
    for j in range(1, POOL):
        pooled = jnp.maximum(pooled, buf_ref[pl.ds(j, half, stride=POOL), :])
    o_ref[...] = pooled.astype(o_ref.dtype)


def _vmem_limit_bytes():
    try:
        cap = int(pltpu.get_tpu_info().vmem_capacity_bytes)
    except Exception:
        cap = 64 << 20            # conservative default (v7x per-core VMEM)
    return int(min(cap * 3 // 4, 96 << 20))


def _pick_groups_per_step(G, L, budget_bytes):
    """Largest groups-per-step under a VMEM budget; prefer >=2 grid steps so
    both v7x TensorCores get work (costs one extra ~0.5us step on v5e/v6e)."""
    per_row_bytes = 14 * LANES * 4      # ~live f32 128-lane slabs per packed row
    max_rows = max(L, budget_bytes // per_row_bytes)
    gps = max(1, min(G, max_rows // L, max(1, G // 2)))
    while G % gps != 0:
        gps -= 1
    # (8,128) block alignment is only required when the block doesn't span the
    # full array; tiny L falls back to one big block (always within budget).
    if gps != G and ((gps * L) % 8 != 0 or (gps * (L // POOL)) % 8 != 0):
        gps = G
    return gps


def residual_stack(x, w1, w2, w3, w4, w5):
    """x: (N, Cin, L) f32 (PyTorch NCL).  Weights in PyTorch Conv1d layout
    (Cout, Cin, k), bias-free (module uses bias=False).
    Returns (N, MID, L // POOL), matching the module."""
    N, Cin, L = x.shape
    assert L % POOL == 0, "MaxPool1d(2,2) branch assumes L even"
    Lout = L // POOL

    # Pad the batch to a multiple of PACK (zero sequences are sliced off below).
    Np = ((N + PACK - 1) // PACK) * PACK
    if Np != N:
        x = jnp.concatenate([x, jnp.zeros((Np - N, Cin, L), x.dtype)], axis=0)
    G = Np // PACK

    # Lane packing: row = (group, position); lanes = PACK sequences x channels.
    x_packed = jnp.transpose(x.reshape(G, PACK, Cin, L), (0, 3, 1, 2))
    x_packed = x_packed.reshape(G * L, PACK * Cin).astype(jnp.float32)

    # Block-diagonal (kron with I_PACK) weights: one matmul serves all PACK
    # packed sequences without cross-talk between their channel groups.
    eye = jnp.eye(PACK, dtype=jnp.float32)
    w1_bd = jnp.kron(eye, jnp.transpose(w1[:, :, 0]).astype(jnp.float32))

    def conv_bd(w):   # (MID, MID, KSIZE) -> (KSIZE, 128, 128), tap-major
        taps = jnp.transpose(w, (2, 1, 0)).astype(jnp.float32)  # (k, Cin, Cout)
        return jnp.stack([jnp.kron(eye, taps[t]) for t in range(KSIZE)])

    w_stack = jnp.stack([conv_bd(w) for w in (w2, w3, w4, w5)])  # (4,3,128,128)

    # Grid sizing: few large steps (amortize per-step overhead), VMEM-budgeted.
    vmem_limit = _vmem_limit_bytes()
    gps = _pick_groups_per_step(G, L, vmem_limit // 2)
    grid = G // gps
    rows_step = gps * L

    # Per-position boundary masks, identical for every grid step -> constant
    # index_map means they are DMA'd once, not recomputed/refetched per step.
    pos = jnp.arange(rows_step, dtype=jnp.int32) % L
    m_prev = jnp.broadcast_to((pos != 0).astype(jnp.float32)[:, None],
                              (rows_step, LANES))
    m_next = jnp.broadcast_to((pos != (L - 1)).astype(jnp.float32)[:, None],
                              (rows_step, LANES))

    flops = 2 * Np * L * (Cin * MID + 4 * KSIZE * MID * MID)
    bytes_accessed = 4 * (x_packed.size + m_prev.size + m_next.size
                          + w1_bd.size + w_stack.size + G * Lout * LANES)

    out = pl.pallas_call(
        residual_stack_kernel,
        out_shape=jax.ShapeDtypeStruct((G * Lout, LANES), jnp.float32),
        grid_spec=pltpu.PrefetchScalarGridSpec(
            num_scalar_prefetch=0,
            grid=(grid,),
            in_specs=[
                pl.BlockSpec((rows_step, PACK * Cin), lambda i: (i, 0)),
                pl.BlockSpec((rows_step, LANES), lambda i: (0, 0)),
                pl.BlockSpec((rows_step, LANES), lambda i: (0, 0)),
                pl.BlockSpec((PACK * Cin, LANES), lambda i: (0, 0)),
                pl.BlockSpec((4, KSIZE, LANES, LANES), lambda i: (0, 0, 0, 0)),
            ],
            out_specs=pl.BlockSpec((gps * Lout, LANES), lambda i: (i, 0)),
            scratch_shapes=[pltpu.VMEM((rows_step, LANES), jnp.float32)],
        ),
        compiler_params=pltpu.CompilerParams(
            dimension_semantics=("parallel",),
            vmem_limit_bytes=vmem_limit),
        cost_estimate=pl.CostEstimate(
            flops=int(flops), transcendentals=0,
            bytes_accessed=int(bytes_accessed)),
    )(x_packed, m_prev, m_next, w1_bd, w_stack)

    # (G*Lout, PACK*MID) -> (Np, MID, Lout) -> drop the batch padding.
    out = out.reshape(G, Lout, PACK, MID).transpose(0, 2, 3, 1)
    return out.reshape(Np, MID, Lout)[:N]


def residual_stack_ref(x, w1, w2, w3, w4, w5):
    """Pure-JAX reference reproducing the PyTorch forward (NCL layout)."""
    dn = ('NCH', 'OIH', 'NCH')
    conv = lambda h, w, p: lax.conv_general_dilated(
        h, w, window_strides=(1,), padding=[(p, p)], dimension_numbers=dn)
    h = conv(x, w1, 0)
    sc = h
    h = jax.nn.relu(conv(h, w2, PAD))
    h = jax.nn.relu(conv(h, w3, PAD) + sc)
    sc = h
    h = jax.nn.relu(conv(h, w4, PAD))
    h = jax.nn.relu(conv(h, w5, PAD) + sc)
    h = lax.reduce_window(h, -jnp.inf, lax.max,
                          (1, 1, POOL), (1, 1, POOL), 'VALID')
    return h


if __name__ == "__main__":
    key = jax.random.PRNGKey(0)
    N, Cin, L = 16, 4, 64
    ks = jax.random.split(key, 6)

    x = jax.random.normal(ks[0], (N, Cin, L), dtype=jnp.float32)
    # Deterministic synthetic weights in PyTorch Conv1d layout (Cout, Cin, k).
    w1 = 0.30 * jax.random.normal(ks[1], (MID, Cin, 1), dtype=jnp.float32)
    w2 = 0.10 * jax.random.normal(ks[2], (MID, MID, KSIZE), dtype=jnp.float32)
    w3 = 0.10 * jax.random.normal(ks[3], (MID, MID, KSIZE), dtype=jnp.float32)
    w4 = 0.10 * jax.random.normal(ks[4], (MID, MID, KSIZE), dtype=jnp.float32)
    w5 = 0.10 * jax.random.normal(ks[5], (MID, MID, KSIZE), dtype=jnp.float32)

    out = jax.block_until_ready(residual_stack(x, w1, w2, w3, w4, w5))
    ref = residual_stack_ref(x, w1, w2, w3, w4, w5)

    assert out.shape == (N, MID, L // POOL), out.shape
    max_err = float(jnp.max(jnp.abs(out - ref)))
    assert jnp.allclose(out, ref, atol=5e-4, rtol=5e-4), max_err
    print("KERNEL_OK")
</pallas_src>

<mosaic_0001>
module attributes {stable_mosaic.version = 11 : i64} {
  func.func @residual_stack_kernel(%arg0: i32, %arg1: memref<128x16xf32, #tpu.memory_space<vmem>>, %arg2: memref<128x128xf32, #tpu.memory_space<vmem>>, %arg3: memref<128x128xf32, #tpu.memory_space<vmem>>, %arg4: memref<16x128xf32, #tpu.memory_space<vmem>>, %arg5: memref<4x3x128x128xf32, #tpu.memory_space<vmem>>, %arg6: memref<64x128xf32, #tpu.memory_space<vmem>>, %arg7: memref<128x128xf32, #tpu.memory_space<vmem>>) attributes {dimension_semantics = [#tpu.dimension_semantics<parallel>], iteration_bounds = array<i64: 2>, scalar_prefetch = 0 : i64, scratch_operands = 1 : i64, tpu.core_type = #tpu.core_type<tc>, window_params = [{transform_indices = @transform_0, window_bounds = array<i64: 128, 16>}, {pipeline_mode = #tpu.pipeline_mode<synchronous>, transform_indices = @transform_1, window_bounds = array<i64: 128, 128>}, {pipeline_mode = #tpu.pipeline_mode<synchronous>, transform_indices = @transform_2, window_bounds = array<i64: 128, 128>}, {pipeline_mode = #tpu.pipeline_mode<synchronous>, transform_indices = @transform_3, window_bounds = array<i64: 16, 128>}, {pipeline_mode = #tpu.pipeline_mode<synchronous>, transform_indices = @transform_4, window_bounds = array<i64: 4, 3, 128, 128>}, {transform_indices = @transform_5, window_bounds = array<i64: 64, 128>}]} {
    %c0 = arith.constant 0 : index
    %c0_0 = arith.constant 0 : index
    %0 = vector.load %arg2[%c0, %c0_0] : memref<128x128xf32, #tpu.memory_space<vmem>>, vector<128x128xf32>
    %c0_1 = arith.constant 0 : index
    %c0_2 = arith.constant 0 : index
    %1 = vector.load %arg3[%c0_1, %c0_2] : memref<128x128xf32, #tpu.memory_space<vmem>>, vector<128x128xf32>
    %c0_3 = arith.constant 0 : index
    %c0_4 = arith.constant 0 : index
    %2 = vector.load %arg1[%c0_3, %c0_4] : memref<128x16xf32, #tpu.memory_space<vmem>>, vector<128x16xf32>
    %c0_5 = arith.constant 0 : index
    %c0_6 = arith.constant 0 : index
    %3 = vector.load %arg4[%c0_5, %c0_6] : memref<16x128xf32, #tpu.memory_space<vmem>>, vector<16x128xf32>
    %cst = arith.constant dense<0.000000e+00> : vector<128x128xf32>
    %4 = tpu.matmul %2, %3, %cst {dimension_numbers = #tpu.dot_dimension_numbers<[1], [0], [0], [1], [0, 0, 1, 1], [], []>} : vector<128x16xf32>, vector<16x128xf32>, vector<128x128xf32> -> vector<128x128xf32>
    %c1_i32 = arith.constant 1 : i32
    %5 = tpu.dynamic_rotate %4 by %c1_i32 dim 0 : vector<128x128xf32>, i32 -> vector<128x128xf32>
    %6 = arith.mulf %0, %5 : vector<128x128xf32>
    %c127_i32 = arith.constant 127 : i32
    %7 = tpu.dynamic_rotate %4 by %c127_i32 dim 0 : vector<128x128xf32>, i32 -> vector<128x128xf32>
    %8 = arith.mulf %1, %7 : vector<128x128xf32>
    %c0_7 = arith.constant 0 : index
    %c0_8 = arith.constant 0 : index
    %c0_9 = arith.constant 0 : index
    %c0_10 = arith.constant 0 : index
    %9 = vector.load %arg5[%c0_7, %c0_8, %c0_9, %c0_10] : memref<4x3x128x128xf32, #tpu.memory_space<vmem>>, vector<1x1x128x128xf32>
    %10 = vector.shape_cast %9 : vector<1x1x128x128xf32> to vector<128x128xf32>
    %cst_11 = arith.constant dense<0.000000e+00> : vector<128x128xf32>
    %11 = tpu.matmul %6, %10, %cst_11 {dimension_numbers = #tpu.dot_dimension_numbers<[1], [0], [0], [1], [0, 0, 1, 1], [], []>} : vector<128x128xf32>, vector<128x128xf32>, vector<128x128xf32> -> vector<128x128xf32>
    %c0_12 = arith.constant 0 : index
    %c1 = arith.constant 1 : index
    %c0_13 = arith.constant 0 : index
    %c0_14 = arith.constant 0 : index
    %12 = vector.load %arg5[%c0_12, %c1, %c0_13, %c0_14] : memref<4x3x128x128xf32, #tpu.memory_space<vmem>>, vector<1x1x128x128xf32>
    %13 = vector.shape_cast %12 : vector<1x1x128x128xf32> to vector<128x128xf32>
    %cst_15 = arith.constant dense<0.000000e+00> : vector<128x128xf32>
    %14 = tpu.matmul %4, %13, %cst_15 {dimension_numbers = #tpu.dot_dimension_numbers<[1], [0], [0], [1], [0, 0, 1, 1], [], []>} : vector<128x128xf32>, vector<128x128xf32>, vector<128x128xf32> -> vector<128x128xf32>
    %15 = arith.addf %11, %14 : vector<128x128xf32>
    %c0_16 = arith.constant 0 : index
    %c2 = arith.constant 2 : index
    %c0_17 = arith.constant 0 : index
    %c0_18 = arith.constant 0 : index
    %16 = vector.load %arg5[%c0_16, %c2, %c0_17, %c0_18] : memref<4x3x128x128xf32, #tpu.memory_space<vmem>>, vector<1x1x128x128xf32>
    %17 = vector.shape_cast %16 : vector<1x1x128x128xf32> to vector<128x128xf32>
    %cst_19 = arith.constant dense<0.000000e+00> : vector<128x128xf32>
    %18 = tpu.matmul %8, %17, %cst_19 {dimension_numbers = #tpu.dot_dimension_numbers<[1], [0], [0], [1], [0, 0, 1, 1], [], []>} : vector<128x128xf32>, vector<128x128xf32>, vector<128x128xf32> -> vector<128x128xf32>
    %19 = arith.addf %15, %18 : vector<128x128xf32>
    %cst_20 = arith.constant 0.000000e+00 : f32
    %20 = vector.broadcast %cst_20 : f32 to vector<128x128xf32>
    %21 = arith.maximumf %19, %20 : vector<128x128xf32>
    %c1_i32_21 = arith.constant 1 : i32
    %22 = tpu.dynamic_rotate %21 by %c1_i32_21 dim 0 : vector<128x128xf32>, i32 -> vector<128x128xf32>
    %23 = arith.mulf %0, %22 : vector<128x128xf32>
    %c127_i32_22 = arith.constant 127 : i32
    %24 = tpu.dynamic_rotate %21 by %c127_i32_22 dim 0 : vector<128x128xf32>, i32 -> vector<128x128xf32>
    %25 = arith.mulf %1, %24 : vector<128x128xf32>
    %c1_23 = arith.constant 1 : index
    %c0_24 = arith.constant 0 : index
    %c0_25 = arith.constant 0 : index
    %c0_26 = arith.constant 0 : index
    %26 = vector.load %arg5[%c1_23, %c0_24, %c0_25, %c0_26] : memref<4x3x128x128xf32, #tpu.memory_space<vmem>>, vector<1x1x128x128xf32>
    %27 = vector.shape_cast %26 : vector<1x1x128x128xf32> to vector<128x128xf32>
    %cst_27 = arith.constant dense<0.000000e+00> : vector<128x128xf32>
    %28 = tpu.matmul %23, %27, %cst_27 {dimension_numbers = #tpu.dot_dimension_numbers<[1], [0], [0], [1], [0, 0, 1, 1], [], []>} : vector<128x128xf32>, vector<128x128xf32>, vector<128x128xf32> -> vector<128x128xf32>
    %c1_28 = arith.constant 1 : index
    %c1_29 = arith.constant 1 : index
    %c0_30 = arith.constant 0 : index
    %c0_31 = arith.constant 0 : index
    %29 = vector.load %arg5[%c1_28, %c1_29, %c0_30, %c0_31] : memref<4x3x128x128xf32, #tpu.memory_space<vmem>>, vector<1x1x128x128xf32>
    %30 = vector.shape_cast %29 : vector<1x1x128x128xf32> to vector<128x128xf32>
    %cst_32 = arith.constant dense<0.000000e+00> : vector<128x128xf32>
    %31 = tpu.matmul %21, %30, %cst_32 {dimension_numbers = #tpu.dot_dimension_numbers<[1], [0], [0], [1], [0, 0, 1, 1], [], []>} : vector<128x128xf32>, vector<128x128xf32>, vector<128x128xf32> -> vector<128x128xf32>
    %32 = arith.addf %28, %31 : vector<128x128xf32>
    %c1_33 = arith.constant 1 : index
    %c2_34 = arith.constant 2 : index
    %c0_35 = arith.constant 0 : index
    %c0_36 = arith.constant 0 : index
    %33 = vector.load %arg5[%c1_33, %c2_34, %c0_35, %c0_36] : memref<4x3x128x128xf32, #tpu.memory_space<vmem>>, vector<1x1x128x128xf32>
    %34 = vector.shape_cast %33 : vector<1x1x128x128xf32> to vector<128x128xf32>
    %cst_37 = arith.constant dense<0.000000e+00> : vector<128x128xf32>
    %35 = tpu.matmul %25, %34, %cst_37 {dimension_numbers = #tpu.dot_dimension_numbers<[1], [0], [0], [1], [0, 0, 1, 1], [], []>} : vector<128x128xf32>, vector<128x128xf32>, vector<128x128xf32> -> vector<128x128xf32>
    %36 = arith.addf %32, %35 : vector<128x128xf32>
    %37 = arith.addf %36, %4 : vector<128x128xf32>
    %cst_38 = arith.constant 0.000000e+00 : f32
    %38 = vector.broadcast %cst_38 : f32 to vector<128x128xf32>
    %39 = arith.maximumf %37, %38 : vector<128x128xf32>
    %c1_i32_39 = arith.constant 1 : i32
    %40 = tpu.dynamic_rotate %39 by %c1_i32_39 dim 0 : vector<128x128xf32>, i32 -> vector<128x128xf32>
    %41 = arith.mulf %0, %40 : vector<128x128xf32>
    %c127_i32_40 = arith.constant 127 : i32
    %42 = tpu.dynamic_rotate %39 by %c127_i32_40 dim 0 : vector<128x128xf32>, i32 -> vector<128x128xf32>
    %43 = arith.mulf %1, %42 : vector<128x128xf32>
    %c2_41 = arith.constant 2 : index
    %c0_42 = arith.constant 0 : index
    %c0_43 = arith.constant 0 : index
    %c0_44 = arith.constant 0 : index
    %44 = vector.load %arg5[%c2_41, %c0_42, %c0_43, %c0_44] : memref<4x3x128x128xf32, #tpu.memory_space<vmem>>, vector<1x1x128x128xf32>
    %45 = vector.shape_cast %44 : vector<1x1x128x128xf32> to vector<128x128xf32>
    %cst_45 = arith.constant dense<0.000000e+00> : vector<128x128xf32>
    %46 = tpu.matmul %41, %45, %cst_45 {dimension_numbers = #tpu.dot_dimension_numbers<[1], [0], [0], [1], [0, 0, 1, 1], [], []>} : vector<128x128xf32>, vector<128x128xf32>, vector<128x128xf32> -> vector<128x128xf32>
    %c2_46 = arith.constant 2 : index
    %c1_47 = arith.constant 1 : index
    %c0_48 = arith.constant 0 : index
    %c0_49 = arith.constant 0 : index
    %47 = vector.load %arg5[%c2_46, %c1_47, %c0_48, %c0_49] : memref<4x3x128x128xf32, #tpu.memory_space<vmem>>, vector<1x1x128x128xf32>
    %48 = vector.shape_cast %47 : vector<1x1x128x128xf32> to vector<128x128xf32>
    %cst_50 = arith.constant dense<0.000000e+00> : vector<128x128xf32>
    %49 = tpu.matmul %39, %48, %cst_50 {dimension_numbers = #tpu.dot_dimension_numbers<[1], [0], [0], [1], [0, 0, 1, 1], [], []>} : vector<128x128xf32>, vector<128x128xf32>, vector<128x128xf32> -> vector<128x128xf32>
    %50 = arith.addf %46, %49 : vector<128x128xf32>
    %c2_51 = arith.constant 2 : index
    %c2_52 = arith.constant 2 : index
    %c0_53 = arith.constant 0 : index
    %c0_54 = arith.constant 0 : index
    %51 = vector.load %arg5[%c2_51, %c2_52, %c0_53, %c0_54] : memref<4x3x128x128xf32, #tpu.memory_space<vmem>>, vector<1x1x128x128xf32>
    %52 = vector.shape_cast %51 : vector<1x1x128x128xf32> to vector<128x128xf32>
    %cst_55 = arith.constant dense<0.000000e+00> : vector<128x128xf32>
    %53 = tpu.matmul %43, %52, %cst_55 {dimension_numbers = #tpu.dot_dimension_numbers<[1], [0], [0], [1], [0, 0, 1, 1], [], []>} : vector<128x128xf32>, vector<128x128xf32>, vector<128x128xf32> -> vector<128x128xf32>
    %54 = arith.addf %50, %53 : vector<128x128xf32>
    %cst_56 = arith.constant 0.000000e+00 : f32
    %55 = vector.broadcast %cst_56 : f32 to vector<128x128xf32>
    %56 = arith.maximumf %54, %55 : vector<128x128xf32>
    %c1_i32_57 = arith.constant 1 : i32
    %57 = tpu.dynamic_rotate %56 by %c1_i32_57 dim 0 : vector<128x128xf32>, i32 -> vector<128x128xf32>
    %58 = arith.mulf %0, %57 : vector<128x128xf32>
    %c127_i32_58 = arith.constant 127 : i32
    %59 = tpu.dynamic_rotate %56 by %c127_i32_58 dim 0 : vector<128x128xf32>, i32 -> vector<128x128xf32>
    %60 = arith.mulf %1, %59 : vector<128x128xf32>
    %c3 = arith.constant 3 : index
    %c0_59 = arith.constant 0 : index
    %c0_60 = arith.constant 0 : index
    %c0_61 = arith.constant 0 : index
    %61 = vector.load %arg5[%c3, %c0_59, %c0_60, %c0_61] : memref<4x3x128x128xf32, #tpu.memory_space<vmem>>, vector<1x1x128x128xf32>
    %62 = vector.shape_cast %61 : vector<1x1x128x128xf32> to vector<128x128xf32>
    %cst_62 = arith.constant dense<0.000000e+00> : vector<128x128xf32>
    %63 = tpu.matmul %58, %62, %cst_62 {dimension_numbers = #tpu.dot_dimension_numbers<[1], [0], [0], [1], [0, 0, 1, 1], [], []>} : vector<128x128xf32>, vector<128x128xf32>, vector<128x128xf32> -> vector<128x128xf32>
    %c3_63 = arith.constant 3 : index
    %c1_64 = arith.constant 1 : index
    %c0_65 = arith.constant 0 : index
    %c0_66 = arith.constant 0 : index
    %64 = vector.load %arg5[%c3_63, %c1_64, %c0_65, %c0_66] : memref<4x3x128x128xf32, #tpu.memory_space<vmem>>, vector<1x1x128x128xf32>
    %65 = vector.shape_cast %64 : vector<1x1x128x128xf32> to vector<128x128xf32>
    %cst_67 = arith.constant dense<0.000000e+00> : vector<128x128xf32>
    %66 = tpu.matmul %56, %65, %cst_67 {dimension_numbers = #tpu.dot_dimension_numbers<[1], [0], [0], [1], [0, 0, 1, 1], [], []>} : vector<128x128xf32>, vector<128x128xf32>, vector<128x128xf32> -> vector<128x128xf32>
    %67 = arith.addf %63, %66 : vector<128x128xf32>
    %c3_68 = arith.constant 3 : index
    %c2_69 = arith.constant 2 : index
    %c0_70 = arith.constant 0 : index
    %c0_71 = arith.constant 0 : index
    %68 = vector.load %arg5[%c3_68, %c2_69, %c0_70, %c0_71] : memref<4x3x128x128xf32, #tpu.memory_space<vmem>>, vector<1x1x128x128xf32>
    %69 = vector.shape_cast %68 : vector<1x1x128x128xf32> to vector<128x128xf32>
    %cst_72 = arith.constant dense<0.000000e+00> : vector<128x128xf32>
    %70 = tpu.matmul %60, %69, %cst_72 {dimension_numbers = #tpu.dot_dimension_numbers<[1], [0], [0], [1], [0, 0, 1, 1], [], []>} : vector<128x128xf32>, vector<128x128xf32>, vector<128x128xf32> -> vector<128x128xf32>
    %71 = arith.addf %67, %70 : vector<128x128xf32>
    %72 = arith.addf %71, %39 : vector<128x128xf32>
    %cst_73 = arith.constant 0.000000e+00 : f32
    %73 = vector.broadcast %cst_73 : f32 to vector<128x128xf32>
    %74 = arith.maximumf %72, %73 : vector<128x128xf32>
    %c0_74 = arith.constant 0 : index
    %c0_75 = arith.constant 0 : index
    %75 = vector.load %arg7[%c0_74, %c0_75] : memref<128x128xf32, #tpu.memory_space<vmem>>, vector<128x128xf32>
    tpu.vector_store %arg7[%c0_74, %c0_75], %74 {strides = array<i32>} : memref<128x128xf32, #tpu.memory_space<vmem>>, vector<128x128xf32>,
    %c0_76 = arith.constant 0 : index
    %c0_77 = arith.constant 0 : index
    %76 = tpu.strided_load %arg7[%c0_76, %c0_77] {strides = array<i32: 2, 1>} : memref<128x128xf32, #tpu.memory_space<vmem>>, vector<64x128xf32>
    %c1_78 = arith.constant 1 : index
    %c0_79 = arith.constant 0 : index
    %77 = tpu.strided_load %arg7[%c1_78, %c0_79] {strides = array<i32: 2, 1>} : memref<128x128xf32, #tpu.memory_space<vmem>>, vector<64x128xf32>
    %78 = arith.maximumf %76, %77 : vector<64x128xf32>
    %c0_80 = arith.constant 0 : index
    %c0_81 = arith.constant 0 : index
    %79 = vector.load %arg6[%c0_80, %c0_81] : memref<64x128xf32, #tpu.memory_space<vmem>>, vector<64x128xf32>
    tpu.vector_store %arg6[%c0_80, %c0_81], %78 {strides = array<i32>} : memref<64x128xf32, #tpu.memory_space<vmem>>, vector<64x128xf32>,
    return
  }
  func.func @transform_0(%arg0: i32) -> (i32, i32) {
    %c0_i32 = arith.constant 0 : i32
    %c0_i32_0 = arith.constant 0 : i32
    return %arg0, %c0_i32 : i32, i32
  }
  func.func @transform_1(%arg0: i32) -> (i32, i32) {
    %c0_i32 = arith.constant 0 : i32
    %c0_i32_0 = arith.constant 0 : i32
    %c0_i32_1 = arith.constant 0 : i32
    return %c0_i32, %c0_i32_0 : i32, i32
  }
  func.func @transform_2(%arg0: i32) -> (i32, i32) {
    %c0_i32 = arith.constant 0 : i32
    %c0_i32_0 = arith.constant 0 : i32
    %c0_i32_1 = arith.constant 0 : i32
    return %c0_i32, %c0_i32_0 : i32, i32
  }
  func.func @transform_3(%arg0: i32) -> (i32, i32) {
    %c0_i32 = arith.constant 0 : i32
    %c0_i32_0 = arith.constant 0 : i32
    %c0_i32_1 = arith.constant 0 : i32
    return %c0_i32, %c0_i32_0 : i32, i32
  }
  func.func @transform_4(%arg0: i32) -> (i32, i32, i32, i32) {
    %c0_i32 = arith.constant 0 : i32
    %c0_i32_0 = arith.constant 0 : i32
    %c0_i32_1 = arith.constant 0 : i32
    %c0_i32_2 = arith.constant 0 : i32
    %c0_i32_3 = arith.constant 0 : i32
    return %c0_i32, %c0_i32_0, %c0_i32_1, %c0_i32_2 : i32, i32, i32, i32
  }
  func.func @transform_5(%arg0: i32) -> (i32, i32) {
    %c0_i32 = arith.constant 0 : i32
    %c0_i32_0 = arith.constant 0 : i32
    return %arg0, %c0_i32 : i32, i32
  }
}

</mosaic_0001>

<bundles_post_ra>
// kernel: tpu_custom_call.1
= control target key start
LH: loop header
LB: loop body
LE: loop exit
PB: predicated region body
PF: predicated region fallthrough
CT: control target
= control target key end

     0   :  { %10 = vsyncpa [#allocation4], 0  ;;  %s6401_s0 = inlined_call_operand.vmem [shape: f32[256,16], index: 0, kind: input, shape index: {}]   ;;  %s6402_s1 = inlined_call_operand.vmem [shape: f32[128,128], index: 1, kind: input, shape index: {}]   ;;  %s6403_s2 = inlined_call_operand.vmem [shape: f32[128,128], index: 2, kind: input, shape index: {}]   ;;  %s6404_s3 = inlined_call_operand.vmem [shape: f32[16,128], index: 3, kind: input, shape index: {}]   ;;  %s6405_s4 = inlined_call_operand.hbm [shape: f32[4,3,128,128], index: 4, kind: input, shape index: {}]   ;;  %s6406_s5 = inlined_call_operand.hbm [shape: f32[128,128], index: 5, kind: output, shape index: {}]  }
   0x1   :  { %11 = vsyncpa [#allocation5], 0 }
   0x2   :  { %13 = vsyncpa [#allocation5 + $0x1], 0  ;;  %s4994_s18 = smov 0   ;;  %s4996_s19 = smov 0  }
   0x3   :  { %s4998_s20 = smov 0   ;;  %s5000_s21 = smov 0  }
   0x4 LB: > { %s5015_s22 = sadd.s32 4294967295, %s4956_s21   ;;  %s3127_s23 = sadd.s32 4294967294, %s4956_s21   ;;  %s4956_s21 = sphi %s5000_s21, %s6601_s21   ;;  %s4952_s20 = sphi %s4998_s20, %s6600_s20   ;;  %s4948_s19 = sphi %s4996_s19, %s6599_s19   ;;  %s4944_s18 = sphi %s4994_s18, %s6598_s18  }
   0x5   : > { %s5019_s24 = sadd.s32 1, %s4956_s21   ;;  %s136_s25 = sadd.s32 1, %s4952_s20 }
   0x6   : > { %s133_s26 = ssub.s32 %s4956_s21, %s5019_s24  ;;  %p146_p0 = scmp.ne.s32.totalorder %s4952_s20, %s4948_s19 }
   0x7   : > { %p134_p1 = scmp.eq.s32.totalorder %s133_s26, 0  ;;  %p147_p2 = scmp.eq.s32.totalorder %s5015_s22, 1 }
   0x8   : > { %p152_p3 = scmp.ne.s32.totalorder %s4948_s19, %s4944_s18  ;;  %p153_p4 = scmp.eq.s32.totalorder %s3127_s23, 1 }
   0x9   : > { %s5030_s27 = scalar_select %p134_p1, %s4952_s20, %s136_s25  }
   0xa   : > { %p5032_p5 = por %p147_p2, %p146_p0  ;;  %p5036_p6 = por %p153_p4, %p152_p3 }
   0xb   : > { %p3128_p7 = scmp.ge.s32.totalorder %s4956_s21, 1  ;;  %p160_p8 = scmp.lt.s32.totalorder %s4956_s21, 3 }
   0xc   : > { %s6465_s28 = scalar_select %p5032_p5, 1, 0 }
   0xd   : > { %s6466_s29 = scalar_select %p5036_p6, 1, 0 }
   0xe   : > { %p6407_p9 = scmp.eq.s32.totalorder %s5015_s22, 0  ;;  %p5043_p10 = pnand %p3128_p7, %p160_p8 }
   0xf   : > { %s4958_s6 = smov [#allocation3]   ;;  %s4862_s11 = scalar_lea.hbm %s6405_s4, 24576 }
  0x10   : > { %s6467_s30 = scalar_select %p5043_p10, 1, 0 }
  0x11   : > { %s181_s7 = sshll.u32 %s4958_s6, 4  ;;  %p4782_p11 = pneg %p5043_p10  ;;  %s182_s7 = int_to_ptr.vmem [resolvable:$true] %s181_s7 }
  0x12   : > { %p4863_p13 = scmp.ne.s32.totalorder %s6405_s4, %s4862_s11  ;;  %p4869_p3 = scmp.lt.u32.totalorder %s4862_s11, %s6405_s4 }
  0x13   : > { %p5051_p12 = pnand %p6407_p9, %p4782_p11 }
  0x15   : > { %p4864_p0 = pneg %p5051_p12 }
  0x17   : > { %p4865_p1 = pnand %p4864_p0, %p4863_p13 }
  0x19   : > { %p4866_p2 = pneg %p4865_p1 }
  0x1b   : > { %p4871_p4 = pnand %p4869_p3, %p4866_p2 }
  0x1d   : > { %4874 = shalt.err (!%p4871_p4)
}
  0x1e   : > { %s4875_s16 = scalar_lea.vmem %s182_s7, 24576  ;;  %p4883_p9 = scmp.lt.s32.totalorder %s182_s7, %s182_s7 }
  0x1f   : > { %p4876_p7 = scmp.ne.s32.totalorder %s182_s7, %s4875_s16  ;;  %p4884_p6 = scmp.lt.s32.totalorder %s4875_s16, %s4875_s16 }
  0x21   : > { %p4878_p8 = pnand %p4876_p7, %p4864_p0  ;;  %p4885_p5 = por %p4884_p6, %p4883_p9 }
  0x23   : > { %p4879_p11 = pneg %p4878_p8 }
  0x25   : > { %p4886_p10 = pnand %p4885_p5, %p4879_p11 }
  0x27   : > { %4889 = shalt.err (!%p4886_p10)
}
  0x28   : > { %s4959_s17 = smov 128   ;;  %s4960_s23 = smov 8  }
  0x29   : > { %4785 = dma.hbm_to_vmem [thread:$0]  (!%p5051_p12), %s6405_s4, 24576, %s182_s7, [#allocation4], %s4959_s17, %s4959_s17, %s4960_s23  }
  0x2a   : > { %p6469_p13 = scmp.ne.s32.totalorder %s6467_s30, 0 }
  0x2c   : > { %206 = sbr.rel (%p6469_p13) target bundleno = 1452 (0x5ac), region = 40 }
  0x33   : > { %p6470_p1 = scmp.eq.s32.totalorder %s5015_s22, 0 }
  0x35   : > { %4935 = dma.done.wait (%p6470_p1), [#allocation4], 24576   ;;  %p6471_p0 = pmov %p6470_p1 }
  0x36   : > { %s3134_s6 = sshll.u32 %s5015_s22, 4  ;;  %vm291_vm0 = vcmask 130048   ;;  %v289_v0 = vld [vmem:[%s6404_s3] sm:$0xff]  ;;  %v290_v1 = vld [vmem:[%s6404_s3 + $0x8] sm:$0xff]  ;;  %v604_v8 = vld [vmem:[#allocation3 + $0x90] sm:$0xff]  ;;  %s231_s14 = sand.u32 1, %s4948_s19  }
  0x37   : > { %4937 = vsyncadd (%p6471_p0), [#allocation4], 4294942720  ;;  %p235_p5 = scmp.lt.s32.totalorder %s3134_s6, 31  ;;  %v4260_v3 = vpack.c.bf16 %v290_v1, %v289_v0  ;;  %v602_v6 = vld [vmem:[#allocation3 + $0x80] sm:$0xff]  ;;  %v603_v7 = vld [vmem:[#allocation3 + $0x88] sm:$0xff]  ;;  %s3133_s15 = sshll.u32 %s231_s14, 6 }
  0x38   : > { %v4264_v9 = vpack.c.bf16 %v603_v7, %v602_v6  ;;  %v605_v10 = vld [vmem:[#allocation3 + $0x98] sm:$0xff]  ;;  %v606_v13 = vld [vmem:[#allocation3 + $0xa0] sm:$0xff]  ;;  %v607_v14 = vld [vmem:[#allocation3 + $0xa8] sm:$0xff]  ;;  %s6331_s16 = scalar_lea.vmem [#allocation6], %s3133_s15  ;;  %s3157_s17 = sshll.u32 %s5015_s22, 10 }
  0x39   : > { %s6603_s6 = smov (!%p235_p5, %s3134_s6), 31  ;;  %4261 = vmatprep.subr.bf16.mxu0 %v4260_v3  ;;  %v4268_v12 = vpack.c.bf16 %v605_v10, %v604_v8  ;;  %v4272_v16 = vpack.c.bf16 %v607_v14, %v606_v13  ;;  %v608_v18 = vld [vmem:[#allocation3 + $0xb0] sm:$0xff]  ;;  %v609_v19 = vld [vmem:[#allocation3 + $0xb8] sm:$0xff]  ;;  %v610_v23 = vld [vmem:[#allocation3 + $0xc0] sm:$0xff]  ;;  %s3053_s23 = sshll.u32 %s6331_s16, 4  ;;  %s6355_s23 = int_to_ptr.vmem [resolvable:$true] %s3053_s23 }
  0x3a   : > { %s3135_s9 = sshll.u32 %s6603_s6, 3  ;;  %4263 = vmatpush3.bf16.msra.mxu0 %v4260_v3  ;;  %4265 = vmatprep.subr.bf16.mxu1 %v4264_v9  ;;  %v4276_v21 = vpack.c.bf16 %v609_v19, %v608_v18  ;;  %v611_v24 = vld [vmem:[#allocation3 + $0xc8] sm:$0xff]  ;;  %v612_v28 = vld [vmem:[#allocation3 + $0xd0] sm:$0xff]  ;;  %v613_v29 = vld [vmem:[#allocation3 + $0xd8] sm:$0xff]  ;;  %v501_v3 = vlaneseq  ;;  %s6353_s6 = scalar_lea.hbm %s6406_s5, %s3157_s17 }
  0x3b   : > { %s5081_s11 = scalar_lea.vmem %s6401_s0, %s3135_s9  ;;  %4267 = vmatpush3.bf16.msra.mxu1 %v4264_v9  ;;  %v4280_v26 = vpack.c.bf16 %v611_v24, %v610_v23  ;;  %v4284_v31 = vpack.c.bf16 %v613_v29, %v612_v28  ;;  %v614_v33 = vld [vmem:[#allocation3 + $0xe0] sm:$0xff]  ;;  %v615_v34 = vld [vmem:[#allocation3 + $0xe8] sm:$0xff]  ;;  %v616_v38 = vld [vmem:[#allocation3 + $0xf0] sm:$0xff]  ;;  %s6360_s9 = scalar_lea.sflag [#allocation5], %s231_s14 }
  0x3c   : > { %v273_v2 = vld [vmem:[%s5081_s11] sm:$0xff]  ;;  %v274_v4 = vld [vmem:[%s5081_s11 + $0x8] sm:$0xff]  ;;  %v275_v5 = vld [vmem:[%s5081_s11 + $0x10] sm:$0xff]  ;;  %4269 = vmatprep.subr.bf16.mxu1 %v4268_v12  ;;  %v4288_v36 = vpack.c.bf16 %v615_v34, %v614_v33  ;;  %s4890_s22 = scalar_lea.vmem %s6355_s23, 1024  ;;  %p6596_p9 = scmp.ne.s32.totalorder %s6465_s28, 0 }
  0x3d   : > { %3564 = vmatprep.mubr.msk.f32.mxu0 %vm291_vm0, %v273_v2  ;;  %v276_v11 = vld [vmem:[%s5081_s11 + $0x18] sm:$0xff]  ;;  %v277_v15 = vld [vmem:[%s5081_s11 + $0x20] sm:$0xff]  ;;  %v278_v17 = vld [vmem:[%s5081_s11 + $0x28] sm:$0xff]  ;;  %p4891_p6 = scmp.ne.s32.totalorder %s6355_s23, %s4890_s22  ;;  %s4961_s8 = smov [#allocation6]  }
  0x3e   : > { %3565 = vmatmul.mubr.msk.f32.vlgmr.msra.gmra.mrb[0].mxu0 %vm291_vm0, %v274_v4  ;;  %v279_v20 = vld [vmem:[%s5081_s11 + $0x30] sm:$0xff]  ;;  %v280_v22 = vld [vmem:[%s5081_s11 + $0x38] sm:$0xff]  ;;  %v281_v25 = vld [vmem:[%s5081_s11 + $0x40] sm:$0xff]  ;;  %v5121_v4 = vshrl.u32 %v501_v3, 7  ;;  %s4894_s10 = sshll.u32 %s4961_s8, 4  ;;  %s4895_s10 = int_to_ptr.vmem [resolvable:$false] %s4894_s10 }
  0x3f   : > { %3567 = vmatprep.mubr.msk.f32.mxu0 %vm291_vm0, %v275_v5  ;;  %4271 = vmatpush3.bf16.msra.mxu1 %v4268_v12  ;;  %v282_v27 = vld [vmem:[%s5081_s11 + $0x48] sm:$0xff]  ;;  %v283_v30 = vld [vmem:[%s5081_s11 + $0x50] sm:$0xff]  ;;  %v284_v32 = vld [vmem:[%s5081_s11 + $0x58] sm:$0xff]  ;;  %p4892_p10 = pnand %p4891_p6, %p6596_p9  ;;  %p4897_p2 = scmp.lt.s32.totalorder %s6355_s23, %s4895_s10 }
  0x40   : > { %4273 = vmatprep.subr.bf16.mxu1 %v4272_v16  ;;  %v285_v35 = vld [vmem:[%s5081_s11 + $0x60] sm:$0xff]  ;;  %v286_v37 = vld [vmem:[%s5081_s11 + $0x68] sm:$0xff]  ;;  %v617_v39 = vld [vmem:[#allocation3 + $0xf8] sm:$0xff]  ;;  %vm503_vm1 = vcmp.lt.s32.totalorder %v5121_v4, 1  ;;  %vm552_vm2 = vcmp.lt.s32.totalorder %v5121_v4, 7 }
  0x41   : > { %v287_v40 = vld [vmem:[%s5081_s11 + $0x70] sm:$0xff]  ;;  %v4292_v41 = vpack.c.bf16 %v617_v39, %v616_v38  ;;  %v288_v42 = vld [vmem:[%s5081_s11 + $0x78] sm:$0xff]  ;;  %v585_v43 = vld [vmem:[#allocation3] sm:$0xff]  ;;  %p4893_p12 = pneg %p4892_p10  ;;  %s4896_s11 = scalar_lea.vmem %s4895_s10, 2048 }
  0x42   : > { %3568 = vmatmul.mubr.msk.f32.gmra.mrb[2].mxu0 %vm291_vm0, %v276_v11  ;;  %v586_v44 = vld [vmem:[#allocation3 + $0x8] sm:$0xff]  ;;  %v1216_v46 = vld [vmem:[#allocation3 + $0x200] sm:$0xff]  ;;  %v1218_v48 = vld [vmem:[#allocation3 + $0x210] sm:$0xff]  ;;  %p4898_p3 = scmp.lt.s32.totalorder %s4896_s11, %s4890_s22 }
  0x43   : > { %3570 = vmatprep.mubr.msk.f32.mxu0 %vm291_vm0, %v277_v15  ;;  %4275 = vmatpush3.bf16.msra.mxu1 %v4272_v16  ;;  %v4296_v45 = vpack.c.bf16 %v586_v44, %v585_v43  ;;  %v1217_v47 = vld [vmem:[#allocation3 + $0x208] sm:$0xff]  ;;  %v1219_v50 = vld [vmem:[#allocation3 + $0x218] sm:$0xff]  ;;  %v1220_v52 = vld [vmem:[#allocation3 + $0x220] sm:$0xff] }
  0x44   : > { %4277 = vmatprep.subr.bf16.mxu1 %v4276_v21  ;;  %v4360_v49 = vpack.c.bf16 %v1217_v47, %v1216_v46  ;;  %v4364_v51 = vpack.c.bf16 %v1219_v50, %v1218_v48  ;;  %v1221_v53 = vld [vmem:[#allocation3 + $0x228] sm:$0xff]  ;;  %v1222_v55 = vld [vmem:[#allocation3 + $0x230] sm:$0xff]  ;;  %v1223_v56 = vld [vmem:[#allocation3 + $0x238] sm:$0xff]  ;;  %p4899_p4 = por %p4898_p3, %p4897_p2 }
  0x45   : > { %v4368_v54 = vpack.c.bf16 %v1221_v53, %v1220_v52  ;;  %v4372_v57 = vpack.c.bf16 %v1223_v56, %v1222_v55  ;;  %v1224_v58 = vld [vmem:[#allocation3 + $0x240] sm:$0xff]  ;;  %v1225_v59 = vld [vmem:[#allocation3 + $0x248] sm:$0xff]  ;;  %v1226_v61 = vld [vmem:[#allocation3 + $0x250] sm:$0xff] }
  0x46   : > { %3571 = vmatmul.mubr.msk.f32.gmra.mrb[4].mxu0 %vm291_vm0, %v278_v17  ;;  %4361 = vmatprep.subr.bf16.mxu0 %v4360_v49  ;;  %v4376_v60 = vpack.c.bf16 %v1225_v59, %v1224_v58  ;;  %v1227_v62 = vld [vmem:[#allocation3 + $0x258] sm:$0xff]  ;;  %v1228_v0 = vld [vmem:[#allocation3 + $0x260] sm:$0xff]  ;;  %v1229_v1 = vld [vmem:[#allocation3 + $0x268] sm:$0xff]  ;;  %p4900_p7 = pnand %p4899_p4, %p4893_p12 }
  0x47   : > { %3573 = vmatprep.mubr.msk.f32.mxu0 %vm291_vm0, %v279_v20  ;;  %4279 = vmatpush3.bf16.msra.mxu1 %v4276_v21  ;;  %v4380_v63 = vpack.c.bf16 %v1227_v62, %v1226_v61  ;;  %v4384_v2 = vpack.c.bf16 %v1229_v1, %v1228_v0  ;;  %v587_v5 = vld [vmem:[#allocation3 + $0x10] sm:$0xff]  ;;  %v588_v6 = vld [vmem:[#allocation3 + $0x18] sm:$0xff]  ;;  %v589_v14 = vld [vmem:[#allocation3 + $0x20] sm:$0xff] }
  0x48   : > { %4281 = vmatprep.subr.bf16.mxu1 %v4280_v26  ;;  %4363 = vmatpush3.bf16.msra.mxu0 %v4360_v49  ;;  %v4300_v11 = vpack.c.bf16 %v588_v6, %v587_v5  ;;  %v590_v15 = vld [vmem:[#allocation3 + $0x28] sm:$0xff]  ;;  %v593_v38 = vld [vmem:[#allocation3 + $0x40] sm:$0xff]  ;;  %v596_v52 = vld [vmem:[#allocation3 + $0x58] sm:$0xff] }
  0x49   : > { %4365 = vmatprep.subr.bf16.mxu0 %v4364_v51  ;;  %v594_v39 = vld [vmem:[#allocation3 + $0x48] sm:$0xff]  ;;  %v597_v0 = vld [vmem:[#allocation3 + $0x60] sm:$0xff]  ;;  %v2773_v4 = vld [vmem:[#allocation3 + $0x5b0] sm:$0xff] }
  0x4a   : > { %3574 = vmatmul.mubr.msk.f32.gmra.mrb[6].mxu0 %vm291_vm0, %v280_v22  ;;  %v4304_v22 = vpack.c.bf16 %v590_v15, %v589_v14  ;;  %v4312_v48 = vpack.c.bf16 %v594_v39, %v593_v38  ;;  %v598_v1 = vld [vmem:[#allocation3 + $0x68] sm:$0xff] }
  0x4b   : > { %3576 = vmatprep.mubr.msk.f32.mxu0 %vm291_vm0, %v281_v25  ;;  %4283 = vmatpush3.bf16.msra.mxu1 %v4280_v26  ;;  %v591_v25 = vld [vmem:[#allocation3 + $0x30] sm:$0xff]  ;;  %v592_v26 = vld [vmem:[#allocation3 + $0x38] sm:$0xff]  ;;  %v4320_v15 = vpack.c.bf16 %v598_v1, %v597_v0  ;;  %v5317_v1 = vld [vmem:[%s6402_s1 + $0x8] sm:$0xff] }
  0x4c   : > { %4285 = vmatprep.subr.bf16.mxu1 %v4284_v31  ;;  %4367 = vmatpush3.bf16.msra.mxu0 %v4364_v51  ;;  %v595_v51 = vld [vmem:[#allocation3 + $0x50] sm:$0xff] }
  0x4d   : > { %4369 = vmatprep.subr.bf16.mxu0 %v4368_v54  ;;  %v4316_v61 = vpack.c.bf16 %v596_v52, %v595_v51 }
  0x4e   : > { %3577 = vmatmul.mubr.msk.f32.gmra.mrb[8].mxu0 %vm291_vm0, %v282_v27 }
  0x4f   : > { %3579 = vmatprep.mubr.msk.f32.mxu0 %vm291_vm0, %v283_v30  ;;  %4287 = vmatpush3.bf16.msra.mxu1 %v4284_v31 }
  0x50   : > { %4289 = vmatprep.subr.bf16.mxu1 %v4288_v36  ;;  %4371 = vmatpush3.bf16.msra.mxu0 %v4368_v54 }
  0x51   : > { %4373 = vmatprep.subr.bf16.mxu0 %v4372_v57 }
  0x52   : > { %3580 = vmatmul.mubr.msk.f32.gmra.mrb[10].mxu0 %vm291_vm0, %v284_v32 }
  0x53   : > { %3582 = vmatprep.mubr.msk.f32.mxu0 %vm291_vm0, %v285_v35  ;;  %4291 = vmatpush3.bf16.msra.mxu1 %v4288_v36  ;;  %v4308_v35 = vpack.c.bf16 %v592_v26, %v591_v25 }
  0x54   : > { %4293 = vmatprep.subr.bf16.mxu1 %v4292_v41  ;;  %4375 = vmatpush3.bf16.msra.mxu0 %v4372_v57 }
  0x55   : > { %4377 = vmatprep.subr.bf16.mxu0 %v4376_v60 }
  0x56   : > { %3583 = vmatmul.mubr.msk.f32.gmra.mrb[12].mxu0 %vm291_vm0, %v286_v37 }
  0x57   : > { %3585 = vmatprep.mubr.msk.f32.mxu0 %vm291_vm0, %v287_v40  ;;  %4295 = vmatpush3.bf16.msra.mxu1 %v4292_v41 }
  0x58   : > { %4297 = vmatprep.subr.bf16.mxu1 %v4296_v45  ;;  %4379 = vmatpush3.bf16.msra.mxu0 %v4376_v60 }
  0x59   : > { %4381 = vmatprep.subr.bf16.mxu0 %v4380_v63 }
  0x5a   : > { %3586 = vmatmul.mubr.msk.f32.gmra.mrb[14].mxu0 %vm291_vm0, %v288_v42 }
  0x5c   : > { %4383 = vmatpush3.bf16.msra.mxu0 %v4380_v63 }
  0x5d   : > { %4385 = vmatprep.subr.bf16.mxu0 %v4384_v2 }
  0x60   : > { %4387 = vmatpush3.bf16.msra.mxu0 %v4384_v2 }
 0x111   : > { %v5123_v7 = vpop.f32.mrb[0].mxu0 }
 0x112   : > { %6472 = vst [vmem:[#allocation9_spill] sm:$0xff] %v5123_v7  ;;  %v486_v8 = vrot.slane %v5123_v7, 7  ;;  %v537_v9 = vrot.slane %v5123_v7, 1  ;;  %v5128_v10 = vpop.f32.mrb[1].mxu0 }
 0x113   : > { %6473 = vst [vmem:[#allocation10_spill] sm:$0xff] %v5128_v10  ;;  %v485_v12 = vrot.slane %v5128_v10, 7  ;;  %v536_v13 = vrot.slane %v5128_v10, 1  ;;  %3620 = vmatprep.mubr.f32.mxu1 %v5128_v10 }
 0x114   : > { %3621 = vmatmul.mubr.f32.vlgmr.msra.gmra.mrb[0].mxu1 %v5123_v7 }
 0x115   : > { %v5139_v16 = vsel %vm503_vm1, %v485_v12, %v486_v8  ;;  %4299 = vmatpush3.bf16.msra.mxu1 %v4296_v45  ;;  %v5141_v17 = vpop.f32.mrb[2].mxu0  ;;  %v5147_v18 = vsel %vm552_vm2, %v536_v13, %v537_v9 }
 0x116   : > { %6474 = vst [vmem:[#allocation11_spill] sm:$0xff] %v5141_v17  ;;  %v488_v19 = vrot.slane %v5141_v17, 7  ;;  %v539_v20 = vrot.slane %v5141_v17, 1  ;;  %v5151_v21 = vpop.f32.mrb[3].mxu0  ;;  %4301 = vmatprep.subr.bf16.mxu1 %v4300_v11 }
 0x117   : > { %6475 = vst [vmem:[#allocation12_spill] sm:$0xff] %v5151_v21  ;;  %v487_v23 = vrot.slane %v5151_v21, 7  ;;  %v538_v24 = vrot.slane %v5151_v21, 1  ;;  %3623 = vmatprep.mubr.f32.mxu1 %v5151_v21 }
 0x118   : > { %3624 = vmatmul.mubr.f32.gmra.mrb[2].mxu1 %v5141_v17  ;;  %v1210_v17 = vld [vmem:[#allocation3 + $0x1d8] sm:$0xff] }
 0x119   : > { %v5159_v27 = vsel %vm552_vm2, %v537_v9, %v538_v24  ;;  %4303 = vmatpush3.bf16.msra.mxu1 %v4300_v11  ;;  %v5161_v28 = vpop.f32.mrb[4].mxu0  ;;  %v5165_v29 = vsel %vm503_vm1, %v486_v8, %v487_v23  ;;  %v5169_v30 = vsel %vm503_vm1, %v487_v23, %v488_v19  ;;  %v5173_v31 = vsel %vm552_vm2, %v538_v24, %v539_v20  ;;  %v600_v23 = vld [vmem:[#allocation3 + $0x78] sm:$0xff] }
 0x11a   : > { %6476 = vst [vmem:[#allocation13_spill] sm:$0xff] %v5161_v28  ;;  %v490_v32 = vrot.slane %v5161_v28, 7  ;;  %v541_v33 = vrot.slane %v5161_v28, 1  ;;  %v5177_v34 = vpop.f32.mrb[5].mxu0  ;;  %4305 = vmatprep.subr.bf16.mxu1 %v4304_v22 }
 0x11b   : > { %6477 = vst [vmem:[#allocation14_spill] sm:$0xff] %v5177_v34  ;;  %v489_v36 = vrot.slane %v5177_v34, 7  ;;  %v540_v37 = vrot.slane %v5177_v34, 1  ;;  %3626 = vmatprep.mubr.f32.mxu1 %v5177_v34  ;;  %v1208_v34 = vld [vmem:[#allocation3 + $0x1c8] sm:$0xff] }
 0x11c   : > { %3627 = vmatmul.mubr.f32.gmra.mrb[4].mxu1 %v5161_v28 }
 0x11d   : > { %4307 = vmatpush3.bf16.msra.mxu1 %v4304_v22  ;;  %v5183_v40 = vpop.f32.mrb[6].mxu0  ;;  %v5187_v41 = vsel %vm503_vm1, %v488_v19, %v489_v36  ;;  %v5191_v42 = vsel %vm503_vm1, %v489_v36, %v490_v32  ;;  %v5195_v43 = vsel %vm552_vm2, %v539_v20, %v540_v37  ;;  %v5199_v44 = vsel %vm552_vm2, %v540_v37, %v541_v33  ;;  %v599_v22 = vld [vmem:[#allocation3 + $0x70] sm:$0xff] }
 0x11e   : > { %6478 = vst [vmem:[#allocation15_spill] sm:$0xff] %v5183_v40  ;;  %v492_v45 = vrot.slane %v5183_v40, 7  ;;  %v543_v46 = vrot.slane %v5183_v40, 1  ;;  %v5203_v47 = vpop.f32.mrb[7].mxu0  ;;  %4309 = vmatprep.subr.bf16.mxu1 %v4308_v35  ;;  %v4324_v38 = vpack.c.bf16 %v600_v23, %v599_v22  ;;  %v5330_v22 = vld [vmem:[%s6402_s1 + $0x10] sm:$0xff] }
 0x11f   : > { %6479 = vst [vmem:[#allocation16_spill] sm:$0xff] %v5203_v47  ;;  %v491_v49 = vrot.slane %v5203_v47, 7  ;;  %v542_v50 = vrot.slane %v5203_v47, 1  ;;  %3629 = vmatprep.mubr.f32.mxu1 %v5203_v47 }
 0x120   : > { %3630 = vmatmul.mubr.f32.gmra.mrb[6].mxu1 %v5183_v40 }
 0x121   : > { %4311 = vmatpush3.bf16.msra.mxu1 %v4308_v35  ;;  %v5209_v53 = vpop.f32.mrb[8].mxu0  ;;  %v5213_v54 = vsel %vm503_vm1, %v490_v32, %v491_v49  ;;  %v5217_v55 = vsel %vm503_vm1, %v491_v49, %v492_v45  ;;  %v5221_v56 = vsel %vm552_vm2, %v541_v33, %v542_v50  ;;  %v5225_v57 = vsel %vm552_vm2, %v542_v50, %v543_v46 }
 0x122   : > { %6480 = vst [vmem:[#allocation17_spill] sm:$0xff] %v5209_v53  ;;  %v494_v58 = vrot.slane %v5209_v53, 7  ;;  %v545_v59 = vrot.slane %v5209_v53, 1  ;;  %v5229_v60 = vpop.f32.mrb[9].mxu0  ;;  %4313 = vmatprep.subr.bf16.mxu1 %v4312_v48 }
 0x123   : > { %6481 = vst [vmem:[#allocation18_spill] sm:$0xff] %v5229_v60  ;;  %v493_v62 = vrot.slane %v5229_v60, 7  ;;  %v544_v63 = vrot.slane %v5229_v60, 1  ;;  %3632 = vmatprep.mubr.f32.mxu1 %v5229_v60  ;;  %v1206_v60 = vld [vmem:[#allocation3 + $0x1b8] sm:$0xff] }
 0x124   : > { %3633 = vmatmul.mubr.f32.gmra.mrb[8].mxu1 %v5209_v53 }
 0x125   : > { %4315 = vmatpush3.bf16.msra.mxu1 %v4312_v48  ;;  %v5235_v2 = vpop.f32.mrb[10].mxu0  ;;  %v5239_v3 = vsel %vm503_vm1, %v492_v45, %v493_v62  ;;  %v5243_v5 = vsel %vm503_vm1, %v493_v62, %v494_v58  ;;  %v5247_v6 = vsel %vm552_vm2, %v543_v46, %v544_v63  ;;  %v5251_v8 = vsel %vm552_vm2, %v544_v63, %v545_v59  ;;  %v909_v46 = vld [vmem:[#allocation3 + $0x100] sm:$0xff]  ;;  %v910_v48 = vld [vmem:[#allocation3 + $0x108] sm:$0xff] }
 0x126   : > { %6482 = vst [vmem:[#allocation19_spill] sm:$0xff] %v5235_v2  ;;  %v496_v9 = vrot.slane %v5235_v2, 7  ;;  %v547_v11 = vrot.slane %v5235_v2, 1  ;;  %v5255_v14 = vpop.f32.mrb[11].mxu0  ;;  %4317 = vmatprep.subr.bf16.mxu1 %v4316_v61  ;;  %v5312_v63 = vld [vmem:[%s6402_s1] sm:$0xff]  ;;  %v4328_v0 = vpack.c.bf16 %v910_v48, %v909_v46  ;;  %v521_v48 = vmul.f32 %v5139_v16, %v5317_v1 }
 0x127   : > { %6483 = vst [vmem:[#allocation20_spill] sm:$0xff] %v5255_v14  ;;  %v495_v19 = vrot.slane %v5255_v14, 7  ;;  %v546_v20 = vrot.slane %v5255_v14, 1  ;;  %3635 = vmatprep.mubr.f32.mxu1 %v5255_v14  ;;  %v5367_v16 = vld [vmem:[%s6402_s1 + $0x20] sm:$0xff] }
 0x128   : > { %3636 = vmatmul.mubr.f32.gmra.mrb[10].mxu1 %v5235_v2  ;;  %v1205_v2 = vld [vmem:[#allocation3 + $0x1b0] sm:$0xff] }
 0x129   : > { %4319 = vmatpush3.bf16.msra.mxu1 %v4316_v61  ;;  %v5261_v24 = vpop.f32.mrb[12].mxu0  ;;  %v5265_v25 = vsel %vm503_vm1, %v494_v58, %v495_v19  ;;  %v5269_v26 = vsel %vm503_vm1, %v495_v19, %v496_v9  ;;  %v5273_v32 = vsel %vm552_vm2, %v545_v59, %v546_v20  ;;  %v5277_v33 = vsel %vm552_vm2, %v546_v20, %v547_v11  ;;  %v912_v19 = vld [vmem:[#allocation3 + $0x118] sm:$0xff] }
 0x12a   : > { %6484 = vst [vmem:[#allocation21_spill] sm:$0xff] %v5261_v24  ;;  %v498_v35 = vrot.slane %v5261_v24, 7  ;;  %v549_v36 = vrot.slane %v5261_v24, 1  ;;  %v5281_v37 = vpop.f32.mrb[13].mxu0  ;;  %4321 = vmatprep.subr.bf16.mxu1 %v4320_v15 }
 0x12b   : > { %6485 = vst [vmem:[#allocation22_spill] sm:$0xff] %v5281_v37  ;;  %v497_v39 = vrot.slane %v5281_v37, 7  ;;  %v548_v45 = vrot.slane %v5281_v37, 1  ;;  %3638 = vmatprep.mubr.f32.mxu1 %v5281_v37 }
 0x12c   : > { %3639 = vmatmul.mubr.f32.gmra.mrb[12].mxu1 %v5261_v24 }
 0x12d   : > { %4323 = vmatpush3.bf16.msra.mxu1 %v4320_v15  ;;  %v5287_v49 = vpop.f32.mrb[14].mxu0  ;;  %v5291_v50 = vsel %vm503_vm1, %v496_v9, %v497_v39  ;;  %v5295_v51 = vsel %vm503_vm1, %v497_v39, %v498_v35  ;;  %v5299_v52 = vsel %vm552_vm2, %v547_v11, %v548_v45  ;;  %v5303_v58 = vsel %vm552_vm2, %v548_v45, %v549_v36  ;;  %v911_v15 = vld [vmem:[#allocation3 + $0x110] sm:$0xff] }
 0x12e   : > { %6486 = vst [vmem:[#allocation23_spill] sm:$0xff] %v5287_v49  ;;  %v500_v59 = vrot.slane %v5287_v49, 7  ;;  %v551_v61 = vrot.slane %v5287_v49, 1  ;;  %v5307_v62 = vpop.f32.mrb[15].mxu0  ;;  %4325 = vmatprep.subr.bf16.mxu1 %v4324_v38 }
 0x12f   : > { %6487 = vst [vmem:[#allocation24_spill] sm:$0xff] %v5307_v62  ;;  %v499_v9 = vrot.slane %v5307_v62, 7  ;;  %v550_v11 = vrot.slane %v5307_v62, 1  ;;  %3641 = vmatprep.mubr.f32.mxu1 %v5307_v62  ;;  %v1851_v62 = vld [vmem:[#allocation3 + $0x3a8] sm:$0xff] }
 0x130   : > { %3642 = vmatmul.mubr.f32.gmra.mrb[14].mxu1 %v5287_v49  ;;  %v519_v20 = vsel %vm503_vm1, %v500_v59, %v485_v12  ;;  %v5336_v23 = vsel %vm552_vm2, %v551_v61, %v536_v13  ;;  %v4332_v13 = vpack.c.bf16 %v912_v19, %v911_v15  ;;  %v5376_v15 = vld [vmem:[%s6402_s1 + $0x28] sm:$0xff]  ;;  %v915_v19 = vld [vmem:[#allocation3 + $0x130] sm:$0xff] }
 0x131   : > { %4327 = vmatpush3.bf16.msra.mxu1 %v4324_v38  ;;  %v520_v39 = vmul.f32 %v519_v20, %v5312_v63  ;;  %v5341_v45 = vsel %vm503_vm1, %v498_v35, %v499_v9  ;;  %v5345_v12 = vsel %vm503_vm1, %v499_v9, %v500_v59  ;;  %v5349_v46 = vsel %vm552_vm2, %v549_v36, %v550_v11  ;;  %v5362_v59 = vld [vmem:[%s6402_s1 + $0x18] sm:$0xff]  ;;  %v913_v36 = vld [vmem:[#allocation3 + $0x120] sm:$0xff]  ;;  %v914_v9 = vld [vmem:[#allocation3 + $0x128] sm:$0xff] }
 0x132   : > { %4329 = vmatprep.subr.bf16.mxu1 %v4328_v0  ;;  %v5355_v38 = vsel %vm552_vm2, %v550_v11, %v551_v61  ;;  %v522_v35 = vmul.f32 %v5165_v29, %v5330_v22  ;;  %v523_v61 = vmul.f32 %v5169_v30, %v5362_v59  ;;  %v4336_v29 = vpack.c.bf16 %v914_v9, %v913_v36  ;;  %v916_v20 = vld [vmem:[#allocation3 + $0x138] sm:$0xff]  ;;  %v918_v36 = vld [vmem:[#allocation3 + $0x148] sm:$0xff]  ;;  %v1856_v49 = vld [vmem:[#allocation3 + $0x3d0] sm:$0xff] }
 0x133   : > { %3676 = vmatprep.mubr.f32.mxu1 %v520_v39  ;;  %v524_v11 = vmul.f32 %v5187_v41, %v5367_v16  ;;  %v525_v30 = vmul.f32 %v5191_v42, %v5376_v15  ;;  %v4340_v41 = vpack.c.bf16 %v916_v20, %v915_v19  ;;  %v920_v19 = vld [vmem:[#allocation3 + $0x158] sm:$0xff] }
 0x134   : > { %3677 = vmatmul.mubr.f32.vlgmr.msra.gmra.mrb[0].mxu1 %v521_v48  ;;  %v5390_v48 = vld [vmem:[%s6402_s1 + $0x38] sm:$0xff] }
 0x135   : > { %4331 = vmatpush3.bf16.msra.mxu1 %v4328_v0  ;;  %3679 = vmatprep.mubr.f32.mxu1 %v522_v35  ;;  %v5381_v0 = vld [vmem:[%s6402_s1 + $0x30] sm:$0xff]  ;;  %v917_v35 = vld [vmem:[#allocation3 + $0x140] sm:$0xff]  ;;  %v527_v42 = vmul.f32 %v5217_v55, %v5390_v48 }
 0x136   : > { %4333 = vmatprep.subr.bf16.mxu1 %v4332_v13  ;;  %v526_v39 = vmul.f32 %v5213_v54, %v5381_v0  ;;  %v4344_v54 = vpack.c.bf16 %v918_v36, %v917_v35  ;;  %v922_v35 = vld [vmem:[#allocation3 + $0x168] sm:$0xff] }
 0x138   : > { %3680 = vmatmul.mubr.f32.gmra.mrb[2].mxu1 %v523_v61  ;;  %v5404_v61 = vld [vmem:[%s6402_s1 + $0x48] sm:$0xff] }
 0x139   : > { %4335 = vmatpush3.bf16.msra.mxu1 %v4332_v13  ;;  %3682 = vmatprep.mubr.f32.mxu1 %v524_v11  ;;  %v5395_v13 = vld [vmem:[%s6402_s1 + $0x40] sm:$0xff]  ;;  %v919_v11 = vld [vmem:[#allocation3 + $0x150] sm:$0xff]  ;;  %v529_v55 = vmul.f32 %v5243_v5, %v5404_v61 }
 0x13a   : > { %4337 = vmatprep.subr.bf16.mxu1 %v4336_v29  ;;  %v528_v9 = vmul.f32 %v5239_v3, %v5395_v13  ;;  %v4348_v3 = vpack.c.bf16 %v920_v19, %v919_v11  ;;  %v924_v11 = vld [vmem:[#allocation3 + $0x178] sm:$0xff] }
 0x13c   : > { %3683 = vmatmul.mubr.f32.gmra.mrb[4].mxu1 %v525_v30  ;;  %v5418_v30 = vld [vmem:[%s6402_s1 + $0x58] sm:$0xff] }
 0x13d   : > { %4339 = vmatpush3.bf16.msra.mxu1 %v4336_v29  ;;  %3685 = vmatprep.mubr.f32.mxu1 %v526_v39  ;;  %v5409_v29 = vld [vmem:[%s6402_s1 + $0x50] sm:$0xff]  ;;  %v921_v39 = vld [vmem:[#allocation3 + $0x160] sm:$0xff]  ;;  %v531_v5 = vmul.f32 %v5269_v26, %v5418_v30 }
 0x13e   : > { %4341 = vmatprep.subr.bf16.mxu1 %v4340_v41  ;;  %v530_v20 = vmul.f32 %v5265_v25, %v5409_v29  ;;  %v4352_v25 = vpack.c.bf16 %v922_v35, %v921_v39  ;;  %v5465_v39 = vld [vmem:[%s6403_s2 + $0x10] sm:$0xff] }
 0x140   : > { %3686 = vmatmul.mubr.f32.gmra.mrb[6].mxu1 %v527_v42  ;;  %v5432_v42 = vld [vmem:[%s6402_s1 + $0x68] sm:$0xff] }
 0x141   : > { %4343 = vmatpush3.bf16.msra.mxu1 %v4340_v41  ;;  %3688 = vmatprep.mubr.f32.mxu1 %v528_v9  ;;  %v5423_v41 = vld [vmem:[%s6402_s1 + $0x60] sm:$0xff]  ;;  %v923_v9 = vld [vmem:[#allocation3 + $0x170] sm:$0xff]  ;;  %v533_v26 = vmul.f32 %v5295_v51, %v5432_v42 }
 0x142   : > { %4345 = vmatprep.subr.bf16.mxu1 %v4344_v54  ;;  %v532_v36 = vmul.f32 %v5291_v50, %v5423_v41  ;;  %v4356_v50 = vpack.c.bf16 %v924_v11, %v923_v9  ;;  %v5507_v11 = vld [vmem:[%s6403_s2 + $0x40] sm:$0xff] }
 0x143   : > { %6489 = vst [vmem:[#allocation26_spill] sm:$0xff] %v5507_v11 }
 0x144   : > { %3689 = vmatmul.mubr.f32.gmra.mrb[8].mxu1 %v529_v55  ;;  %v5446_v55 = vld [vmem:[%s6402_s1 + $0x78] sm:$0xff] }
 0x145   : > { %4347 = vmatpush3.bf16.msra.mxu1 %v4344_v54  ;;  %3691 = vmatprep.mubr.f32.mxu1 %v530_v20  ;;  %v5437_v54 = vld [vmem:[%s6402_s1 + $0x70] sm:$0xff]  ;;  %v5451_v20 = vld [vmem:[%s6403_s2] sm:$0xff]  ;;  %v535_v51 = vmul.f32 %v5345_v12, %v5446_v55  ;;  %v571_v12 = vmul.f32 %v5173_v31, %v5465_v39  ;;  %v5488_v31 = vld [vmem:[%s6403_s2 + $0x28] sm:$0xff] }
 0x146   : > { %4349 = vmatprep.subr.bf16.mxu1 %v4348_v3  ;;  %v534_v19 = vmul.f32 %v5341_v45, %v5437_v54  ;;  %v5458_v45 = vld [vmem:[%s6403_s2 + $0x8] sm:$0xff]  ;;  %v574_v9 = vmul.f32 %v5221_v56, %v5488_v31  ;;  %v577_v56 = vmul.f32 %v5251_v8, %v5507_v11  ;;  %v5530_v8 = vld [vmem:[%s6403_s2 + $0x58] sm:$0xff] }
 0x147   : > { %v570_v35 = vmul.f32 %v5159_v27, %v5458_v45  ;;  %6492 = vst [vmem:[#allocation29_spill] sm:$0xff] %v5530_v8 }
 0x148   : > { %3692 = vmatmul.mubr.f32.gmra.mrb[10].mxu1 %v531_v5  ;;  %v5474_v5 = vld [vmem:[%s6403_s2 + $0x18] sm:$0xff] }
 0x149   : > { %4351 = vmatpush3.bf16.msra.mxu1 %v4348_v3  ;;  %3694 = vmatprep.mubr.f32.mxu1 %v532_v36  ;;  %v569_v3 = vmul.f32 %v5147_v18, %v5451_v20  ;;  %v5479_v18 = vld [vmem:[%s6403_s2 + $0x20] sm:$0xff]  ;;  %v5493_v36 = vld [vmem:[%s6403_s2 + $0x30] sm:$0xff] }
 0x14a   : > { %4353 = vmatprep.subr.bf16.mxu1 %v4352_v25  ;;  %v573_v27 = vmul.f32 %v5199_v44, %v5479_v18  ;;  %v5502_v44 = vld [vmem:[%s6403_s2 + $0x38] sm:$0xff] }
 0x14b   : > { %6488 = vst [vmem:[#allocation25_spill] sm:$0xff] %v5502_v44 }
 0x14c   : > { %3695 = vmatmul.mubr.f32.gmra.mrb[12].mxu1 %v533_v26  ;;  %v576_v26 = vmul.f32 %v5247_v6, %v5502_v44 }
 0x14d   : > { %4355 = vmatpush3.bf16.msra.mxu1 %v4352_v25  ;;  %3697 = vmatprep.mubr.f32.mxu1 %v534_v19  ;;  %v572_v25 = vmul.f32 %v5195_v43, %v5474_v5  ;;  %v575_v43 = vmul.f32 %v5225_v57, %v5493_v36  ;;  %v5516_v57 = vld [vmem:[%s6403_s2 + $0x48] sm:$0xff] }
 0x14e   : > { %4357 = vmatprep.subr.bf16.mxu1 %v4356_v50  ;;  %6490 = vst [vmem:[#allocation27_spill] sm:$0xff] %v5516_v57  ;;  %v578_v19 = vmul.f32 %v5273_v32, %v5516_v57 }
 0x150   : > { %3698 = vmatmul.mubr.f32.gmra.mrb[14].mxu1 %v535_v51  ;;  %v5535_v51 = vld [vmem:[%s6403_s2 + $0x60] sm:$0xff] }
 0x151   : > { %4359 = vmatpush3.bf16.msra.mxu1 %v4356_v50  ;;  %3732 = vmatprep.mubr.f32.mxu1 %v569_v3  ;;  %v5521_v50 = vld [vmem:[%s6403_s2 + $0x50] sm:$0xff]  ;;  %6493 = vst [vmem:[#allocation30_spill] sm:$0xff] %v5535_v51  ;;  %v580_v3 = vmul.f32 %v5299_v52, %v5530_v8  ;;  %v581_v32 = vmul.f32 %v5303_v58, %v5535_v51  ;;  %v5558_v58 = vld [vmem:[%s6403_s2 + $0x78] sm:$0xff] }
 0x152   : > { %6491 = vst [vmem:[#allocation28_spill] sm:$0xff] %v5521_v50  ;;  %v579_v6 = vmul.f32 %v5277_v33, %v5521_v50  ;;  %v5544_v33 = vld [vmem:[%s6403_s2 + $0x68] sm:$0xff]  ;;  %6496 = vst [vmem:[#allocation33_spill] sm:$0xff] %v5558_v58  ;;  %v1214_v50 = vld [vmem:[#allocation3 + $0x1f8] sm:$0xff] }
 0x153   : > { %6494 = vst [vmem:[#allocation31_spill] sm:$0xff] %v5544_v33 }
 0x154   : > { %3733 = vmatmul.mubr.f32.vlgmr.msra.gmra.mrb[0].mxu1 %v570_v35  ;;  %v5549_v35 = vld [vmem:[%s6403_s2 + $0x70] sm:$0xff] }
 0x155   : > { %3735 = vmatprep.mubr.f32.mxu1 %v571_v12  ;;  %6495 = vst [vmem:[#allocation32_spill] sm:$0xff] %v5549_v35  ;;  %v582_v12 = vmul.f32 %v5349_v46, %v5544_v33  ;;  %v583_v52 = vmul.f32 %v5355_v38, %v5549_v35  ;;  %v1199_v46 = vld [vmem:[#allocation3 + $0x180] sm:$0xff]  ;;  %v1212_v35 = vld [vmem:[#allocation3 + $0x1e8] sm:$0xff] }
 0x156   : > { %v1846_v38 = vld [vmem:[#allocation3 + $0x380] sm:$0xff] }
 0x158   : > { %3736 = vmatmul.mubr.f32.gmra.mrb[2].mxu1 %v572_v25  ;;  %v584_v25 = vmul.f32 %v5336_v23, %v5558_v58 }
 0x159   : > { %3738 = vmatprep.mubr.f32.mxu1 %v573_v27  ;;  %v1230_v27 = vld [vmem:[#allocation3 + $0x270] sm:$0xff] }
 0x15c   : > { %3739 = vmatmul.mubr.f32.gmra.mrb[4].mxu1 %v574_v9  ;;  %v1231_v9 = vld [vmem:[#allocation3 + $0x278] sm:$0xff] }
 0x15d   : > { %3741 = vmatprep.mubr.f32.mxu1 %v575_v43  ;;  %v4388_v43 = vpack.c.bf16 %v1231_v9, %v1230_v27  ;;  %v1853_v27 = vld [vmem:[#allocation3 + $0x3b8] sm:$0xff] }
 0x15f   : > { %4389 = vmatprep.subr.bf16.mxu0 %v4388_v43 }
 0x160   : > { %3742 = vmatmul.mubr.f32.gmra.mrb[6].mxu1 %v576_v26  ;;  %4391 = vmatpush3.bf16.msra.mxu0 %v4388_v43  ;;  %v1200_v26 = vld [vmem:[#allocation3 + $0x188] sm:$0xff]  ;;  %v1854_v43 = vld [vmem:[#allocation3 + $0x3c0] sm:$0xff] }
 0x161   : > { %3744 = vmatprep.mubr.f32.mxu1 %v577_v56  ;;  %v4392_v56 = vpack.c.bf16 %v1200_v26, %v1199_v46  ;;  %v1855_v46 = vld [vmem:[#allocation3 + $0x3c8] sm:$0xff] }
 0x162   : > { %v4472_v26 = vpack.c.bf16 %v1855_v46, %v1854_v43 }
 0x163   : > { %4393 = vmatprep.subr.bf16.mxu0 %v4392_v56 }
 0x164   : > { %3745 = vmatmul.mubr.f32.gmra.mrb[8].mxu1 %v578_v19  ;;  %v1847_v19 = vld [vmem:[#allocation3 + $0x388] sm:$0xff] }
 0x165   : > { %3747 = vmatprep.mubr.f32.mxu1 %v579_v6  ;;  %v1848_v6 = vld [vmem:[#allocation3 + $0x390] sm:$0xff] }
 0x168   : > { %3748 = vmatmul.mubr.f32.gmra.mrb[10].mxu1 %v580_v3  ;;  %v4456_v3 = vpack.c.bf16 %v1847_v19, %v1846_v38  ;;  %v1857_v38 = vld [vmem:[#allocation3 + $0x3d8] sm:$0xff] }
 0x169   : > { %3750 = vmatprep.mubr.f32.mxu1 %v581_v32  ;;  %v1849_v32 = vld [vmem:[#allocation3 + $0x398] sm:$0xff]  ;;  %v4476_v19 = vpack.c.bf16 %v1857_v38, %v1856_v49 }
 0x16a   : > { %4457 = vmatprep.subr.bf16.mxu1 %v4456_v3 }
 0x16b   : > { %4459 = vmatpush3.bf16.msra.mxu1 %v4456_v3 }
 0x16c   : > { %3751 = vmatmul.mubr.f32.gmra.mrb[12].mxu1 %v582_v12  ;;  %v4460_v12 = vpack.c.bf16 %v1849_v32, %v1848_v6  ;;  %v1858_v6 = vld [vmem:[#allocation3 + $0x3e0] sm:$0xff]  ;;  %v1859_v32 = vld [vmem:[#allocation3 + $0x3e8] sm:$0xff] }
 0x16d   : > { %3753 = vmatprep.mubr.f32.mxu1 %v583_v52  ;;  %v1850_v52 = vld [vmem:[#allocation3 + $0x3a0] sm:$0xff] }
 0x16e   : > { %4461 = vmatprep.subr.bf16.mxu1 %v4460_v12  ;;  %v4464_v23 = vpack.c.bf16 %v1851_v62, %v1850_v52  ;;  %v4480_v62 = vpack.c.bf16 %v1859_v32, %v1858_v6  ;;  %v1202_v52 = vld [vmem:[#allocation3 + $0x198] sm:$0xff]  ;;  %v1204_v6 = vld [vmem:[#allocation3 + $0x1a8] sm:$0xff] }
 0x16f   : > { %4463 = vmatpush3.bf16.msra.mxu1 %v4460_v12  ;;  %v1201_v12 = vld [vmem:[#allocation3 + $0x190] sm:$0xff] }
 0x170   : > { %3754 = vmatmul.mubr.f32.gmra.mrb[14].mxu1 %v584_v25  ;;  %v1852_v25 = vld [vmem:[#allocation3 + $0x3b0] sm:$0xff]  ;;  %4465 = vmatprep.subr.bf16.mxu1 %v4464_v23 }
 0x171   : > { %v4468_v9 = vpack.c.bf16 %v1853_v27, %v1852_v25 }
 0x173   : > { %4467 = vmatpush3.bf16.msra.mxu1 %v4464_v23 }
 0x174   : > { %4469 = vmatprep.subr.bf16.mxu1 %v4468_v9 }
 0x177   : > { %4471 = vmatpush3.bf16.msra.mxu1 %v4468_v9  ;;  %v4396_v9 = vpack.c.bf16 %v1202_v52, %v1201_v12 }
 0x178   : > { %4473 = vmatprep.subr.bf16.mxu1 %v4472_v26 }
 0x17b   : > { %4475 = vmatpush3.bf16.msra.mxu1 %v4472_v26 }
 0x17c   : > { %4477 = vmatprep.subr.bf16.mxu1 %v4476_v19 }
 0x17f   : > { %4479 = vmatpush3.bf16.msra.mxu1 %v4476_v19  ;;  %v1203_v19 = vld [vmem:[#allocation3 + $0x1a0] sm:$0xff] }
 0x180   : > { %4481 = vmatprep.subr.bf16.mxu1 %v4480_v62  ;;  %v4400_v37 = vpack.c.bf16 %v1204_v6, %v1203_v19 }
 0x183   : > { %4483 = vmatpush3.bf16.msra.mxu1 %v4480_v62 }
 0x227   : > { %v3734_v3 = vpop.f32.mrb[0].mxu1 }
 0x228   : > { %v1087_v25 = vmax.f32 %v3734_v3, 0.0  ;;  %v991_v23 = vpop.f32.mrb[1].mxu1 }
 0x229   : > { %v5562_v27 = vmax.f32 %v991_v23, 0.0 }
 0x22a   : > { %v1103_v43 = vrot.slane %v1087_v25, 7  ;;  %v1151_v46 = vrot.slane %v1087_v25, 1 }
 0x22b   : > { %v6417_v49 = vrot.slane %v5562_v27, 7  ;;  %v6419_v38 = vrot.slane %v5562_v27, 1  ;;  %v3737_v26 = vpop.f32.mrb[2].mxu1  ;;  %3788 = vmatprep.mubr.f32.mxu0 %v5562_v27 }
 0x22c   : > { %v1089_v32 = vmax.f32 %v3737_v26, 0.0  ;;  %v1001_v62 = vpop.f32.mrb[3].mxu1  ;;  %3789 = vmatmul.mubr.f32.vlgmr.msra.gmra.mrb[16].mxu0 %v1087_v25 }
 0x22d   : > { %v5571_v3 = vsel %vm503_vm1, %v6417_v49, %v1103_v43  ;;  %v1088_v23 = vmax.f32 %v1001_v62, 0.0  ;;  %4395 = vmatpush3.bf16.msra.mxu0 %v4392_v56  ;;  %v5577_v12 = vsel %vm552_vm2, %v6419_v38, %v1151_v46 }
 0x22e   : > { %v1105_v52 = vrot.slane %v1089_v32, 7  ;;  %4397 = vmatprep.subr.bf16.mxu0 %v4396_v9  ;;  %v1153_v26 = vrot.slane %v1089_v32, 1 }
 0x22f   : > { %v1104_v24 = vrot.slane %v1088_v23, 7  ;;  %v1152_v25 = vrot.slane %v1088_v23, 1  ;;  %v3740_v14 = vpop.f32.mrb[4].mxu1  ;;  %3791 = vmatprep.mubr.f32.mxu0 %v1088_v23  ;;  %v4404_v23 = vpack.c.bf16 %v1206_v60, %v1205_v2 }
 0x230   : > { %v1091_v49 = vmax.f32 %v3740_v14, 0.0  ;;  %v1011_v53 = vpop.f32.mrb[5].mxu1  ;;  %3792 = vmatmul.mubr.f32.gmra.mrb[18].mxu0 %v1089_v32 }
 0x231   : > { %v5581_v56 = vsel %vm552_vm2, %v1151_v46, %v1152_v25  ;;  %v1090_v62 = vmax.f32 %v1011_v53, 0.0  ;;  %4399 = vmatpush3.bf16.msra.mxu0 %v4396_v9  ;;  %v5585_v38 = vsel %vm503_vm1, %v1103_v43, %v1104_v24  ;;  %v5589_v19 = vsel %vm503_vm1, %v1104_v24, %v1105_v52  ;;  %v1207_v46 = vld [vmem:[#allocation3 + $0x1c0] sm:$0xff] }
 0x232   : > { %v1107_v6 = vrot.slane %v1091_v49, 7  ;;  %4401 = vmatprep.subr.bf16.mxu0 %v4400_v37  ;;  %v1155_v14 = vrot.slane %v1091_v49, 1  ;;  %v5593_v53 = vsel %vm552_vm2, %v1152_v25, %v1153_v26  ;;  %v4408_v25 = vpack.c.bf16 %v1208_v34, %v1207_v46 }
 0x233   : > { %v1106_v47 = vrot.slane %v1090_v62, 7  ;;  %v1154_v32 = vrot.slane %v1090_v62, 1  ;;  %v3743_v40 = vpop.f32.mrb[6].mxu1  ;;  %3794 = vmatprep.mubr.f32.mxu0 %v1090_v62 }
 0x234   : > { %v1093_v43 = vmax.f32 %v3743_v40, 0.0  ;;  %v1021_v9 = vpop.f32.mrb[7].mxu1  ;;  %3795 = vmatmul.mubr.f32.gmra.mrb[20].mxu0 %v1091_v49 }
 0x235   : > { %v1092_v28 = vmax.f32 %v1021_v9, 0.0  ;;  %4403 = vmatpush3.bf16.msra.mxu0 %v4400_v37  ;;  %v5597_v24 = vsel %vm503_vm1, %v1105_v52, %v1106_v47  ;;  %v5601_v60 = vsel %vm503_vm1, %v1106_v47, %v1107_v6  ;;  %v5605_v2 = vsel %vm552_vm2, %v1153_v26, %v1154_v32  ;;  %v1209_v37 = vld [vmem:[#allocation3 + $0x1d0] sm:$0xff] }
 0x236   : > { %v1109_v62 = vrot.slane %v1093_v43, 7  ;;  %4405 = vmatprep.subr.bf16.mxu0 %v4404_v23  ;;  %v1157_v40 = vrot.slane %v1093_v43, 1  ;;  %v5609_v52 = vsel %vm552_vm2, %v1154_v32, %v1155_v14  ;;  %v4412_v32 = vpack.c.bf16 %v1210_v17, %v1209_v37 }
 0x237   : > { %v1108_v21 = vrot.slane %v1092_v28, 7  ;;  %v1156_v49 = vrot.slane %v1092_v28, 1  ;;  %v3746_v9 = vpop.f32.mrb[8].mxu1  ;;  %3797 = vmatprep.mubr.f32.mxu0 %v1092_v28 }
 0x238   : > { %v1095_v47 = vmax.f32 %v3746_v9, 0.0  ;;  %v1031_v10 = vpop.f32.mrb[9].mxu1  ;;  %3798 = vmatmul.mubr.f32.gmra.mrb[22].mxu0 %v1093_v43 }
 0x239   : > { %v1094_v7 = vmax.f32 %v1031_v10, 0.0  ;;  %4407 = vmatpush3.bf16.msra.mxu0 %v4404_v23  ;;  %v5613_v26 = vsel %vm503_vm1, %v1107_v6, %v1108_v21  ;;  %v5617_v34 = vsel %vm503_vm1, %v1108_v21, %v1109_v62  ;;  %v5621_v28 = vsel %vm552_vm2, %v1155_v14, %v1156_v49  ;;  %v1211_v23 = vld [vmem:[#allocation3 + $0x1e0] sm:$0xff] }
 0x23a   : > { %v1111_v46 = vrot.slane %v1095_v47, 7  ;;  %4409 = vmatprep.subr.bf16.mxu0 %v4408_v25  ;;  %v1159_v9 = vrot.slane %v1095_v47, 1  ;;  %v5625_v6 = vsel %vm552_vm2, %v1156_v49, %v1157_v40  ;;  %v4416_v49 = vpack.c.bf16 %v1212_v35, %v1211_v23 }
 0x23b   : > { %v1110_v58 = vrot.slane %v1094_v7, 7  ;;  %v1158_v43 = vrot.slane %v1094_v7, 1  ;;  %v3749_v10 = vpop.f32.mrb[10].mxu1  ;;  %3800 = vmatprep.mubr.f32.mxu0 %v1094_v7  ;;  %6497 = vst [vmem:[#allocation34_spill] sm:$0xff] %v5625_v6 }
 0x23c   : > { %v1097_v21 = vmax.f32 %v3749_v10, 0.0  ;;  %v1041_v33 = vpop.f32.mrb[11].mxu1  ;;  %3801 = vmatmul.mubr.f32.gmra.mrb[24].mxu0 %v1095_v47 }
 0x23d   : > { %v1096_v51 = vmax.f32 %v1041_v33, 0.0  ;;  %4411 = vmatpush3.bf16.msra.mxu0 %v4408_v25  ;;  %v5629_v14 = vsel %vm503_vm1, %v1109_v62, %v1110_v58  ;;  %v5633_v17 = vsel %vm503_vm1, %v1110_v58, %v1111_v46  ;;  %v5637_v7 = vsel %vm552_vm2, %v1157_v40, %v1158_v43  ;;  %v1213_v25 = vld [vmem:[#allocation3 + $0x1f0] sm:$0xff] }
 0x23e   : > { %6498 = vst [vmem:[#allocation35_spill] sm:$0xff] %v5637_v7  ;;  %v1113_v37 = vrot.slane %v1097_v21, 7  ;;  %4413 = vmatprep.subr.bf16.mxu0 %v4412_v32  ;;  %v1161_v10 = vrot.slane %v1097_v21, 1  ;;  %v5641_v62 = vsel %vm552_vm2, %v1158_v43, %v1159_v9  ;;  %v4420_v43 = vpack.c.bf16 %v1214_v50, %v1213_v25  ;;  %v1524_v7 = vld [vmem:[#allocation3 + $0x288] sm:$0xff] }
 0x23f   : > { %v1112_v8 = vrot.slane %v1096_v51, 7  ;;  %v1160_v47 = vrot.slane %v1096_v51, 1  ;;  %v3752_v33 = vpop.f32.mrb[12].mxu1  ;;  %3803 = vmatprep.mubr.f32.mxu0 %v1096_v51  ;;  %6499 = vst [vmem:[#allocation36_spill] sm:$0xff] %v5641_v62 }
 0x240   : > { %v1099_v58 = vmax.f32 %v3752_v33, 0.0  ;;  %v1051_v57 = vpop.f32.mrb[13].mxu1  ;;  %3804 = vmatmul.mubr.f32.gmra.mrb[26].mxu0 %v1097_v21 }
 0x241   : > { %v1098_v11 = vmax.f32 %v1051_v57, 0.0  ;;  %4415 = vmatpush3.bf16.msra.mxu0 %v4412_v32  ;;  %v5645_v40 = vsel %vm503_vm1, %v1111_v46, %v1112_v8  ;;  %v5649_v35 = vsel %vm503_vm1, %v1112_v8, %v1113_v37  ;;  %v5653_v51 = vsel %vm552_vm2, %v1159_v9, %v1160_v47  ;;  %v1523_v32 = vld [vmem:[#allocation3 + $0x280] sm:$0xff] }
 0x242   : > { %v1115_v23 = vrot.slane %v1099_v58, 7  ;;  %4417 = vmatprep.subr.bf16.mxu0 %v4416_v49  ;;  %v1163_v33 = vrot.slane %v1099_v58, 1  ;;  %v5657_v46 = vsel %vm552_vm2, %v1160_v47, %v1161_v10 }
 0x243   : > { %v1114_v62 = vrot.slane %v1098_v11, 7  ;;  %v1162_v21 = vrot.slane %v1098_v11, 1  ;;  %v3755_v57 = vpop.f32.mrb[14].mxu1  ;;  %3806 = vmatprep.mubr.f32.mxu0 %v1098_v11  ;;  %6500 = vst [vmem:[#allocation37_spill] sm:$0xff] %v5657_v46 }
 0x244   : > { %v1101_v8 = vmax.f32 %v3755_v57, 0.0  ;;  %v1061_v44 = vpop.f32.mrb[15].mxu1  ;;  %3807 = vmatmul.mubr.f32.gmra.mrb[28].mxu0 %v1099_v58  ;;  %v4424_v57 = vpack.c.bf16 %v1524_v7, %v1523_v32 }
 0x245   : > { %v1100_v6 = vmax.f32 %v1061_v44, 0.0  ;;  %4419 = vmatpush3.bf16.msra.mxu0 %v4416_v49  ;;  %v5661_v9 = vsel %vm503_vm1, %v1113_v37, %v1114_v62  ;;  %v5665_v50 = vsel %vm503_vm1, %v1114_v62, %v1115_v23  ;;  %v5669_v11 = vsel %vm552_vm2, %v1161_v10, %v1162_v21  ;;  %v1525_v44 = vld [vmem:[#allocation3 + $0x290] sm:$0xff]  ;;  %v1526_v49 = vld [vmem:[#allocation3 + $0x298] sm:$0xff] }
 0x246   : > { %6501 = vst [vmem:[#allocation38_spill] sm:$0xff] %v5669_v11  ;;  %v1117_v25 = vrot.slane %v1101_v8, 7  ;;  %v1165_v47 = vrot.slane %v1101_v8, 1  ;;  %4421 = vmatprep.subr.bf16.mxu0 %v4420_v43  ;;  %v5673_v37 = vsel %vm552_vm2, %v1162_v21, %v1163_v33  ;;  %v6502_v62 = vrot.slane %v5562_v27, 7 }
 0x247   : > { %v1116_v46 = vrot.slane %v1100_v6, 7  ;;  %v1164_v58 = vrot.slane %v1100_v6, 1  ;;  %3809 = vmatprep.mubr.f32.mxu0 %v1100_v6  ;;  %v6503_v11 = vrot.slane %v5562_v27, 1  ;;  %v1135_v27 = vmul.f32 %v5571_v3, %v5317_v1 }
 0x248   : > { %3810 = vmatmul.mubr.f32.gmra.mrb[30].mxu0 %v1101_v8  ;;  %v1133_v10 = vsel %vm503_vm1, %v1117_v25, %v6502_v62  ;;  %v1138_v3 = vmul.f32 %v5597_v24, %v5367_v16  ;;  %v1533_v24 = vld [vmem:[#allocation3 + $0x2d0] sm:$0xff]  ;;  %v1536_v62 = vld [vmem:[#allocation3 + $0x2e8] sm:$0xff] }
 0x249   : > { %v5683_v7 = vsel %vm552_vm2, %v1165_v47, %v6503_v11  ;;  %4423 = vmatpush3.bf16.msra.mxu0 %v4420_v43  ;;  %v1134_v6 = vmul.f32 %v1133_v10, %v5312_v63  ;;  %v1119_v32 = vsel %vm503_vm1, %v1115_v23, %v1116_v46  ;;  %v5690_v21 = vsel %vm503_vm1, %v1116_v46, %v1117_v25  ;;  %v1527_v23 = vld [vmem:[#allocation3 + $0x2a0] sm:$0xff]  ;;  %v1528_v46 = vld [vmem:[#allocation3 + $0x2a8] sm:$0xff]  ;;  %v1529_v25 = vld [vmem:[#allocation3 + $0x2b0] sm:$0xff] }
 0x24a   : > { %v5694_v8 = vsel %vm552_vm2, %v1163_v33, %v1164_v58  ;;  %4425 = vmatprep.subr.bf16.mxu0 %v4424_v57  ;;  %v4428_v11 = vpack.c.bf16 %v1526_v49, %v1525_v44  ;;  %v5700_v43 = vsel %vm552_vm2, %v1164_v58, %v1165_v47  ;;  %v1136_v63 = vmul.f32 %v5585_v38, %v5330_v22  ;;  %v1530_v47 = vld [vmem:[#allocation3 + $0x2b8] sm:$0xff]  ;;  %v1531_v58 = vld [vmem:[#allocation3 + $0x2c0] sm:$0xff]  ;;  %v1532_v44 = vld [vmem:[#allocation3 + $0x2c8] sm:$0xff] }
 0x24b   : > { %3844 = vmatprep.mubr.f32.mxu0 %v1134_v6  ;;  %v1137_v33 = vmul.f32 %v5589_v19, %v5362_v59  ;;  %v4432_v1 = vpack.c.bf16 %v1528_v46, %v1527_v23  ;;  %v1139_v22 = vmul.f32 %v5601_v60, %v5376_v15  ;;  %v4436_v38 = vpack.c.bf16 %v1530_v47, %v1529_v25  ;;  %v1534_v49 = vld [vmem:[#allocation3 + $0x2d8] sm:$0xff]  ;;  %v1830_v25 = vld [vmem:[#allocation3 + $0x308] sm:$0xff] }
 0x24c   : > { %3845 = vmatmul.mubr.f32.vlgmr.msra.gmra.mrb[16].mxu0 %v1135_v27  ;;  %v1141_v59 = vmul.f32 %v5617_v34, %v5390_v48  ;;  %v4440_v16 = vpack.c.bf16 %v1532_v44, %v1531_v58  ;;  %v1142_v19 = vmul.f32 %v5629_v14, %v5395_v13  ;;  %v1143_v15 = vmul.f32 %v5633_v17, %v5404_v61  ;;  %v1537_v14 = vld [vmem:[#allocation3 + $0x2f0] sm:$0xff]  ;;  %v1538_v10 = vld [vmem:[#allocation3 + $0x2f8] sm:$0xff]  ;;  %v2464_v44 = vld [vmem:[#allocation3 + $0x520] sm:$0xff] }
 0x24d   : > { %4427 = vmatpush3.bf16.msra.mxu0 %v4424_v57  ;;  %3847 = vmatprep.mubr.f32.mxu0 %v1136_v63  ;;  %v1140_v57 = vmul.f32 %v5613_v26, %v5381_v0  ;;  %v4444_v0 = vpack.c.bf16 %v1534_v49, %v1533_v24  ;;  %v1144_v60 = vmul.f32 %v5645_v40, %v5409_v29  ;;  %v1535_v26 = vld [vmem:[#allocation3 + $0x2e0] sm:$0xff]  ;;  %v6515_v27 = vld [vmem:[#allocation31_spill] sm:$0xff]  ;;  %v6516_v63 = vld [vmem:[#allocation32_spill] sm:$0xff] }
 0x24e   : > { %4429 = vmatprep.subr.bf16.mxu0 %v4428_v11  ;;  %v1145_v48 = vmul.f32 %v5649_v35, %v5418_v30  ;;  %v4448_v13 = vpack.c.bf16 %v1536_v62, %v1535_v26  ;;  %v1146_v34 = vmul.f32 %v5661_v9, %v5423_v41  ;;  %v1147_v61 = vmul.f32 %v5665_v50, %v5432_v42  ;;  %v6508_v9 = vld [vmem:[#allocation36_spill] sm:$0xff]  ;;  %v2468_v49 = vld [vmem:[#allocation3 + $0x540] sm:$0xff] }
 0x24f   : > { %v4452_v29 = vpack.c.bf16 %v1538_v10, %v1537_v14  ;;  %v1148_v17 = vmul.f32 %v1119_v32, %v5437_v54  ;;  %v1149_v30 = vmul.f32 %v5690_v21, %v5446_v55  ;;  %v1182_v41 = vmul.f32 %v5577_v12, %v5451_v20  ;;  %v6504_v12 = vld [vmem:[#allocation34_spill] sm:$0xff]  ;;  %v2471_v26 = vld [vmem:[#allocation3 + $0x558] sm:$0xff]  ;;  %v6518_v10 = vld [vmem:[#allocation9_spill] sm:$0xff] }
 0x250   : > { %3848 = vmatmul.mubr.f32.gmra.mrb[18].mxu0 %v1137_v33  ;;  %v1183_v40 = vmul.f32 %v5581_v56, %v5458_v45  ;;  %v1184_v42 = vmul.f32 %v5593_v53, %v5465_v39  ;;  %v1185_v54 = vmul.f32 %v5605_v2, %v5474_v5  ;;  %v1186_v55 = vmul.f32 %v5609_v52, %v5479_v18  ;;  %v6505_v45 = vld [vmem:[#allocation25_spill] sm:$0xff]  ;;  %v6506_v39 = vld [vmem:[#allocation35_spill] sm:$0xff]  ;;  %v6507_v53 = vld [vmem:[#allocation26_spill] sm:$0xff] }
 0x251   : > { %4431 = vmatpush3.bf16.msra.mxu0 %v4428_v11  ;;  %3850 = vmatprep.mubr.f32.mxu0 %v1138_v3  ;;  %v1187_v20 = vmul.f32 %v5621_v28, %v5488_v31  ;;  %v1188_v35 = vmul.f32 %v6504_v12, %v5493_v36  ;;  %v1189_v56 = vmul.f32 %v6506_v39, %v6505_v45  ;;  %v6509_v5 = vld [vmem:[#allocation27_spill] sm:$0xff]  ;;  %v6510_v2 = vld [vmem:[#allocation28_spill] sm:$0xff]  ;;  %v6511_v52 = vld [vmem:[#allocation37_spill] sm:$0xff] }
 0x252   : > { %4433 = vmatprep.subr.bf16.mxu0 %v4432_v1  ;;  %v1190_v50 = vmul.f32 %v6508_v9, %v6507_v53  ;;  %v1191_v18 = vmul.f32 %v5653_v51, %v6509_v5  ;;  %v1192_v6 = vmul.f32 %v6511_v52, %v6510_v2  ;;  %v6512_v31 = vld [vmem:[#allocation29_spill] sm:$0xff]  ;;  %v6513_v36 = vld [vmem:[#allocation38_spill] sm:$0xff]  ;;  %v1195_v11 = vmul.f32 %v5694_v8, %v6515_v27  ;;  %v1860_v33 = vld [vmem:[#allocation3 + $0x3f0] sm:$0xff] }
 0x253   : > { %v1193_v28 = vmul.f32 %v6513_v36, %v6512_v31  ;;  %v6514_v32 = vld [vmem:[#allocation30_spill] sm:$0xff]  ;;  %v1196_v23 = vmul.f32 %v5700_v43, %v6516_v63  ;;  %v6517_v51 = vld [vmem:[#allocation33_spill] sm:$0xff]  ;;  %v2463_v43 = vld [vmem:[#allocation3 + $0x518] sm:$0xff] }
 0x254   : > { %3851 = vmatmul.mubr.f32.gmra.mrb[20].mxu0 %v1139_v22  ;;  %v1194_v21 = vmul.f32 %v5673_v37, %v6514_v32  ;;  %v1197_v46 = vmul.f32 %v5683_v7, %v6517_v51  ;;  %v1829_v37 = vld [vmem:[#allocation3 + $0x300] sm:$0xff]  ;;  %v2461_v8 = vld [vmem:[#allocation3 + $0x508] sm:$0xff]  ;;  %v6523_v39 = vld [vmem:[#allocation12_spill] sm:$0xff] }
 0x255   : > { %4435 = vmatpush3.bf16.msra.mxu0 %v4432_v1  ;;  %3853 = vmatprep.mubr.f32.mxu0 %v1140_v57  ;;  %v1861_v1 = vld [vmem:[#allocation3 + $0x3f8] sm:$0xff]  ;;  %v4488_v47 = vpack.c.bf16 %v1830_v25, %v1829_v37  ;;  %v2460_v22 = vld [vmem:[#allocation3 + $0x500] sm:$0xff]  ;;  %v1834_v9 = vld [vmem:[#allocation3 + $0x328] sm:$0xff] }
 0x256   : > { %4437 = vmatprep.subr.bf16.mxu0 %v4436_v38  ;;  %v4484_v3 = vpack.c.bf16 %v1861_v1, %v1860_v33  ;;  %v4552_v57 = vpack.c.bf16 %v2461_v8, %v2460_v22  ;;  %v1833_v53 = vld [vmem:[#allocation3 + $0x320] sm:$0xff]  ;;  %v6527_v36 = vld [vmem:[#allocation14_spill] sm:$0xff]  ;;  %v1835_v32 = vld [vmem:[#allocation3 + $0x330] sm:$0xff] }
 0x257   : > { %v6526_v2 = vld [vmem:[#allocation13_spill] sm:$0xff]  ;;  %v4496_v31 = vpack.c.bf16 %v1834_v9, %v1833_v53  ;;  %v6531_v1 = vld [vmem:[#allocation16_spill] sm:$0xff]  ;;  %v1838_v25 = vld [vmem:[#allocation3 + $0x348] sm:$0xff] }
 0x258   : > { %3854 = vmatmul.mubr.f32.gmra.mrb[22].mxu0 %v1141_v59  ;;  %4485 = vmatprep.subr.bf16.mxu1 %v4484_v3  ;;  %v2465_v59 = vld [vmem:[#allocation3 + $0x528] sm:$0xff]  ;;  %v1837_v37 = vld [vmem:[#allocation3 + $0x340] sm:$0xff] }
 0x259   : > { %4439 = vmatpush3.bf16.msra.mxu0 %v4436_v38  ;;  %3856 = vmatprep.mubr.f32.mxu0 %v1142_v19  ;;  %v2462_v38 = vld [vmem:[#allocation3 + $0x510] sm:$0xff]  ;;  %v4560_v7 = vpack.c.bf16 %v2465_v59, %v2464_v44  ;;  %v2467_v19 = vld [vmem:[#allocation3 + $0x538] sm:$0xff]  ;;  %v6535_v44 = vld [vmem:[#allocation18_spill] sm:$0xff] }
 0x25a   : > { %4441 = vmatprep.subr.bf16.mxu0 %v4440_v16  ;;  %4487 = vmatpush3.bf16.msra.mxu1 %v4484_v3  ;;  %v4556_v58 = vpack.c.bf16 %v2463_v43, %v2462_v38  ;;  %v6534_v38 = vld [vmem:[#allocation17_spill] sm:$0xff] }
 0x25b   : > { %4489 = vmatprep.subr.bf16.mxu1 %v4488_v47 }
 0x25c   : > { %3857 = vmatmul.mubr.f32.gmra.mrb[24].mxu0 %v1143_v15  ;;  %v2469_v15 = vld [vmem:[#allocation3 + $0x548] sm:$0xff] }
 0x25d   : > { %4443 = vmatpush3.bf16.msra.mxu0 %v4440_v16  ;;  %3859 = vmatprep.mubr.f32.mxu0 %v1144_v60  ;;  %v2466_v16 = vld [vmem:[#allocation3 + $0x530] sm:$0xff] }
 0x25e   : > { %4445 = vmatprep.subr.bf16.mxu0 %v4444_v0  ;;  %v4564_v24 = vpack.c.bf16 %v2467_v19, %v2466_v16  ;;  %v2470_v60 = vld [vmem:[#allocation3 + $0x550] sm:$0xff]  ;;  %v1840_v16 = vld [vmem:[#allocation3 + $0x358] sm:$0xff] }
 0x25f   : > { %v4572_v62 = vpack.c.bf16 %v2471_v26, %v2470_v60 }
 0x260   : > { %3860 = vmatmul.mubr.f32.gmra.mrb[26].mxu0 %v1145_v48  ;;  %v2472_v48 = vld [vmem:[#allocation3 + $0x560] sm:$0xff] }
 0x261   : > { %4447 = vmatpush3.bf16.msra.mxu0 %v4444_v0  ;;  %3862 = vmatprep.mubr.f32.mxu0 %v1146_v34  ;;  %v4568_v0 = vpack.c.bf16 %v2469_v15, %v2468_v49  ;;  %v6538_v15 = vld [vmem:[#allocation19_spill] sm:$0xff] }
 0x262   : > { %4449 = vmatprep.subr.bf16.mxu0 %v4448_v13 }
 0x264   : > { %3863 = vmatmul.mubr.f32.gmra.mrb[28].mxu0 %v1147_v61 }
 0x265   : > { %4451 = vmatpush3.bf16.msra.mxu0 %v4448_v13  ;;  %3865 = vmatprep.mubr.f32.mxu0 %v1148_v17  ;;  %v2473_v13 = vld [vmem:[#allocation3 + $0x568] sm:$0xff] }
 0x266   : > { %4453 = vmatprep.subr.bf16.mxu0 %v4452_v29  ;;  %v4576_v34 = vpack.c.bf16 %v2473_v13, %v2472_v48  ;;  %v6519_v17 = vld [vmem:[#allocation10_spill] sm:$0xff]  ;;  %v1841_v13 = vld [vmem:[#allocation3 + $0x360] sm:$0xff] }
 0x268   : > { %3866 = vmatmul.mubr.f32.gmra.mrb[30].mxu0 %v1149_v30 }
 0x269   : > { %4455 = vmatpush3.bf16.msra.mxu0 %v4452_v29  ;;  %3900 = vmatprep.mubr.f32.mxu0 %v1182_v41  ;;  %v1831_v41 = vld [vmem:[#allocation3 + $0x310] sm:$0xff] }
 0x26a   : > { %4553 = vmatprep.subr.bf16.mxu0 %v4552_v57 }
 0x26c   : > { %3901 = vmatmul.mubr.f32.vlgmr.msra.gmra.mrb[16].mxu0 %v1183_v40  ;;  %v1832_v40 = vld [vmem:[#allocation3 + $0x318] sm:$0xff] }
 0x26d   : > { %3903 = vmatprep.mubr.f32.mxu0 %v1184_v42  ;;  %4555 = vmatpush3.bf16.msra.mxu0 %v4552_v57  ;;  %v4492_v45 = vpack.c.bf16 %v1832_v40, %v1831_v41  ;;  %v6543_v40 = vld [vmem:[#allocation22_spill] sm:$0xff] }
 0x26e   : > { %4557 = vmatprep.subr.bf16.mxu0 %v4556_v58 }
 0x270   : > { %3904 = vmatmul.mubr.f32.gmra.mrb[18].mxu0 %v1185_v54 }
 0x271   : > { %3906 = vmatprep.mubr.f32.mxu0 %v1186_v55  ;;  %4559 = vmatpush3.bf16.msra.mxu0 %v4556_v58  ;;  %v4504_v58 = vpack.c.bf16 %v1838_v25, %v1837_v37 }
 0x272   : > { %4561 = vmatprep.subr.bf16.mxu0 %v4560_v7 }
 0x274   : > { %3907 = vmatmul.mubr.f32.gmra.mrb[20].mxu0 %v1187_v20  ;;  %v6522_v20 = vld [vmem:[#allocation11_spill] sm:$0xff] }
 0x275   : > { %3909 = vmatprep.mubr.f32.mxu0 %v1188_v35  ;;  %4563 = vmatpush3.bf16.msra.mxu0 %v4560_v7  ;;  %v1839_v7 = vld [vmem:[#allocation3 + $0x350] sm:$0xff] }
 0x276   : > { %4565 = vmatprep.subr.bf16.mxu0 %v4564_v24  ;;  %v4508_v26 = vpack.c.bf16 %v1840_v16, %v1839_v7  ;;  %v5855_v7 = vld [vmem:[%s6402_s1 + $0x10] sm:$0xff] }
 0x278   : > { %3910 = vmatmul.mubr.f32.gmra.mrb[22].mxu0 %v1189_v56 }
 0x279   : > { %3912 = vmatprep.mubr.f32.mxu0 %v1190_v50  ;;  %4567 = vmatpush3.bf16.msra.mxu0 %v4564_v24 }
 0x27a   : > { %4569 = vmatprep.subr.bf16.mxu0 %v4568_v0 }
 0x27c   : > { %3913 = vmatmul.mubr.f32.gmra.mrb[24].mxu0 %v1191_v18 }
 0x27d   : > { %3915 = vmatprep.mubr.f32.mxu0 %v1192_v6  ;;  %4571 = vmatpush3.bf16.msra.mxu0 %v4568_v0 }
 0x27e   : > { %4573 = vmatprep.subr.bf16.mxu0 %v4572_v62 }
 0x280   : > { %3916 = vmatmul.mubr.f32.gmra.mrb[26].mxu0 %v1193_v28 }
 0x281   : > { %3918 = vmatprep.mubr.f32.mxu0 %v1194_v21  ;;  %4575 = vmatpush3.bf16.msra.mxu0 %v4572_v62  ;;  %v1836_v21 = vld [vmem:[#allocation3 + $0x338] sm:$0xff] }
 0x282   : > { %4577 = vmatprep.subr.bf16.mxu0 %v4576_v34  ;;  %v4500_v33 = vpack.c.bf16 %v1836_v21, %v1835_v32  ;;  %v6539_v62 = vld [vmem:[#allocation20_spill] sm:$0xff] }
 0x284   : > { %3919 = vmatmul.mubr.f32.gmra.mrb[28].mxu0 %v1195_v11 }
 0x285   : > { %3921 = vmatprep.mubr.f32.mxu0 %v1196_v23  ;;  %4579 = vmatpush3.bf16.msra.mxu0 %v4576_v34  ;;  %v6530_v23 = vld [vmem:[#allocation15_spill] sm:$0xff]  ;;  %v1842_v34 = vld [vmem:[#allocation3 + $0x368] sm:$0xff] }
 0x286   : > { %v4512_v41 = vpack.c.bf16 %v1842_v34, %v1841_v13 }
 0x288   : > { %3922 = vmatmul.mubr.f32.gmra.mrb[30].mxu0 %v1197_v46 }
 0x33f   : > { %v3902_v14 = vpop.f32.mrb[16].mxu0 }
 0x340   : > { %v1701_v61 = vadd.f32 %v3902_v14, %v6518_v10  ;;  %v1605_v29 = vpop.f32.mrb[17].mxu0 }
 0x341   : > { %v1700_v30 = vadd.f32 %v1605_v29, %v6519_v17  ;;  %v6542_v29 = vld [vmem:[#allocation21_spill] sm:$0xff] }
 0x342   : > { %v5765_v55 = vmax.f32 %v1701_v61, 0.0 }
 0x343   : > { %v5763_v42 = vmax.f32 %v1700_v30, 0.0  ;;  %v3905_v54 = vpop.f32.mrb[18].mxu0 }
 0x344   : > { %6521 = vst [vmem:[#allocation25_spill] sm:$0xff] %v5765_v55  ;;  %v1703_v12 = vadd.f32 %v3905_v54, %v6522_v20  ;;  %v1615_v35 = vpop.f32.mrb[19].mxu0  ;;  %v1843_v20 = vld [vmem:[#allocation3 + $0x370] sm:$0xff] }
 0x345   : > { %6520 = vst [vmem:[#allocation34_spill] sm:$0xff] %v5763_v42  ;;  %v1702_v56 = vadd.f32 %v1615_v35, %v6523_v39  ;;  %3956 = vmatprep.mubr.f32.mxu1 %v5763_v42 }
 0x346   : > { %3957 = vmatmul.mubr.f32.vlgmr.msra.gmra.mrb[16].mxu1 %v5765_v55  ;;  %v5773_v18 = vmax.f32 %v1703_v12, 0.0  ;;  %v1844_v12 = vld [vmem:[#allocation3 + $0x378] sm:$0xff] }
 0x347   : > { %v5771_v50 = vmax.f32 %v1702_v56, 0.0  ;;  %4491 = vmatpush3.bf16.msra.mxu1 %v4488_v47  ;;  %v3908_v5 = vpop.f32.mrb[20].mxu0  ;;  %v6546_v56 = vld [vmem:[#allocation23_spill] sm:$0xff] }
 0x348   : > { %6525 = vst [vmem:[#allocation26_spill] sm:$0xff] %v5773_v18  ;;  %v1705_v52 = vadd.f32 %v3908_v5, %v6526_v2  ;;  %v1625_v6 = vpop.f32.mrb[21].mxu0  ;;  %4493 = vmatprep.subr.bf16.mxu1 %v4492_v45  ;;  %v4516_v5 = vpack.c.bf16 %v1844_v12, %v1843_v20  ;;  %v1733_v2 = vrot.slane %v5765_v55, 7  ;;  %v5884_v20 = vld [vmem:[%s6402_s1 + $0x28] sm:$0xff] }
 0x349   : > { %6524 = vst [vmem:[#allocation35_spill] sm:$0xff] %v5771_v50  ;;  %v1704_v28 = vadd.f32 %v1625_v6, %v6527_v36  ;;  %3959 = vmatprep.mubr.f32.mxu1 %v5771_v50  ;;  %v6547_v6 = vld [vmem:[#allocation24_spill] sm:$0xff]  ;;  %v2153_v36 = vld [vmem:[#allocation3 + $0x400] sm:$0xff]  ;;  %v1734_v32 = vrot.slane %v5771_v50, 7 }
 0x34a   : > { %3960 = vmatmul.mubr.f32.gmra.mrb[18].mxu1 %v5773_v18  ;;  %v5781_v63 = vmax.f32 %v1705_v52, 0.0  ;;  %v1732_v52 = vrot.slane %v5763_v42, 7 }
 0x34b   : > { %v5779_v27 = vmax.f32 %v1704_v28, 0.0  ;;  %4495 = vmatpush3.bf16.msra.mxu1 %v4492_v45  ;;  %v3911_v11 = vpop.f32.mrb[22].mxu0  ;;  %v2154_v28 = vld [vmem:[#allocation3 + $0x408] sm:$0xff] }
 0x34c   : > { %6529 = vst [vmem:[#allocation27_spill] sm:$0xff] %v5781_v63  ;;  %v1707_v51 = vadd.f32 %v3911_v11, %v6530_v23  ;;  %v1635_v46 = vpop.f32.mrb[23].mxu0  ;;  %4497 = vmatprep.subr.bf16.mxu1 %v4496_v31 }
 0x34d   : > { %6528 = vst [vmem:[#allocation36_spill] sm:$0xff] %v5779_v27  ;;  %v1706_v3 = vadd.f32 %v1635_v46, %v6531_v1  ;;  %3962 = vmatprep.mubr.f32.mxu1 %v5779_v27  ;;  %v1735_v46 = vrot.slane %v5773_v18, 7  ;;  %v2155_v1 = vld [vmem:[#allocation3 + $0x410] sm:$0xff]  ;;  %v1736_v37 = vrot.slane %v5779_v27, 7 }
 0x34e   : > { %3963 = vmatmul.mubr.f32.gmra.mrb[20].mxu1 %v5781_v63  ;;  %v5789_v8 = vmax.f32 %v1707_v51, 0.0  ;;  %v4520_v51 = vpack.c.bf16 %v2154_v28, %v2153_v36  ;;  %v5902_v36 = vld [vmem:[%s6402_s1 + $0x38] sm:$0xff] }
 0x34f   : > { %v5787_v47 = vmax.f32 %v1706_v3, 0.0  ;;  %4499 = vmatpush3.bf16.msra.mxu1 %v4496_v31  ;;  %v3914_v22 = vpop.f32.mrb[24].mxu0  ;;  %v2156_v3 = vld [vmem:[#allocation3 + $0x418] sm:$0xff] }
 0x350   : > { %6533 = vst [vmem:[#allocation37_spill] sm:$0xff] %v5789_v8  ;;  %v1709_v57 = vadd.f32 %v3914_v22, %v6534_v38  ;;  %v1645_v43 = vpop.f32.mrb[25].mxu0  ;;  %4501 = vmatprep.subr.bf16.mxu1 %v4500_v33  ;;  %v1761_v22 = vsel %vm503_vm1, %v1733_v2, %v1734_v32  ;;  %v5842_v38 = vld [vmem:[%s6402_s1] sm:$0xff]  ;;  %v1739_v34 = vrot.slane %v5789_v8, 7 }
 0x351   : > { %6532 = vst [vmem:[#allocation28_spill] sm:$0xff] %v5787_v47  ;;  %v1708_v59 = vadd.f32 %v1645_v43, %v6535_v44  ;;  %3965 = vmatprep.mubr.f32.mxu1 %v5787_v47  ;;  %v5848_v43 = vld [vmem:[%s6402_s1 + $0x8] sm:$0xff]  ;;  %v4524_v44 = vpack.c.bf16 %v2156_v3, %v2155_v1  ;;  %v1766_v16 = vmul.f32 %v5855_v7, %v1761_v22  ;;  %v2163_v3 = vld [vmem:[#allocation3 + $0x450] sm:$0xff] }
 0x352   : > { %3966 = vmatmul.mubr.f32.gmra.mrb[22].mxu1 %v5789_v8  ;;  %v5797_v49 = vmax.f32 %v1709_v57, 0.0 }
 0x353   : > { %v5795_v19 = vmax.f32 %v1708_v59, 0.0  ;;  %4503 = vmatpush3.bf16.msra.mxu1 %v4500_v33  ;;  %v3917_v24 = vpop.f32.mrb[26].mxu0  ;;  %v1762_v33 = vsel %vm503_vm1, %v1732_v52, %v1733_v2  ;;  %v1737_v59 = vrot.slane %v5781_v63, 7  ;;  %v2161_v2 = vld [vmem:[#allocation3 + $0x440] sm:$0xff] }
 0x354   : > { %6537 = vst [vmem:[#allocation38_spill] sm:$0xff] %v5797_v49  ;;  %v1711_v0 = vadd.f32 %v3917_v24, %v6538_v15  ;;  %v1655_v60 = vpop.f32.mrb[27].mxu0  ;;  %4505 = vmatprep.subr.bf16.mxu1 %v4504_v58  ;;  %v1760_v24 = vsel %vm503_vm1, %v1734_v32, %v1735_v46  ;;  %v2157_v15 = vld [vmem:[#allocation3 + $0x420] sm:$0xff] }
 0x355   : > { %6536 = vst [vmem:[#allocation29_spill] sm:$0xff] %v5795_v19  ;;  %v1710_v48 = vadd.f32 %v1655_v60, %v6539_v62  ;;  %3968 = vmatprep.mubr.f32.mxu1 %v5795_v19  ;;  %v1738_v60 = vrot.slane %v5787_v47, 7  ;;  %v5866_v62 = vld [vmem:[%s6402_s1 + $0x18] sm:$0xff] }
 0x356   : > { %3969 = vmatmul.mubr.f32.gmra.mrb[24].mxu1 %v5797_v49  ;;  %v5805_v61 = vmax.f32 %v1711_v0, 0.0  ;;  %v2158_v0 = vld [vmem:[#allocation3 + $0x428] sm:$0xff] }
 0x357   : > { %v5803_v14 = vmax.f32 %v1710_v48, 0.0  ;;  %4507 = vmatpush3.bf16.msra.mxu1 %v4504_v58  ;;  %v3920_v10 = vpop.f32.mrb[28].mxu0  ;;  %v1765_v58 = vmul.f32 %v5848_v43, %v1762_v33  ;;  %v1767_v48 = vmul.f32 %v5866_v62, %v1760_v24  ;;  %v4528_v13 = vpack.c.bf16 %v2158_v0, %v2157_v15  ;;  %v2165_v0 = vld [vmem:[#allocation3 + $0x460] sm:$0xff] }
 0x358   : > { %6541 = vst [vmem:[#allocation31_spill] sm:$0xff] %v5805_v61  ;;  %v1713_v17 = vadd.f32 %v3920_v10, %v6542_v29  ;;  %v1665_v30 = vpop.f32.mrb[29].mxu0  ;;  %4509 = vmatprep.subr.bf16.mxu1 %v4508_v26  ;;  %v5873_v10 = vld [vmem:[%s6402_s1 + $0x20] sm:$0xff] }
 0x359   : > { %6540 = vst [vmem:[#allocation30_spill] sm:$0xff] %v5803_v14  ;;  %v1712_v54 = vadd.f32 %v1665_v30, %v6543_v40  ;;  %3971 = vmatprep.mubr.f32.mxu1 %v5803_v14  ;;  %v2159_v30 = vld [vmem:[#allocation3 + $0x430] sm:$0xff]  ;;  %v1740_v40 = vrot.slane %v5795_v19, 7 }
 0x35a   : > { %3972 = vmatmul.mubr.f32.gmra.mrb[26].mxu1 %v5805_v61  ;;  %v5813_v39 = vmax.f32 %v1713_v17, 0.0  ;;  %v1758_v17 = vsel %vm503_vm1, %v1736_v37, %v1737_v59 }
 0x35b   : > { %v5811_v35 = vmax.f32 %v1712_v54, 0.0  ;;  %4511 = vmatpush3.bf16.msra.mxu1 %v4508_v26  ;;  %v3923_v45 = vpop.f32.mrb[30].mxu0  ;;  %v1759_v26 = vsel %vm503_vm1, %v1735_v46, %v1736_v37  ;;  %v1757_v54 = vsel %vm503_vm1, %v1737_v59, %v1738_v60  ;;  %v1769_v12 = vmul.f32 %v5884_v20, %v1758_v17  ;;  %v5909_v46 = vld [vmem:[%s6402_s1 + $0x40] sm:$0xff]  ;;  %v2164_v37 = vld [vmem:[#allocation3 + $0x458] sm:$0xff] }
 0x35c   : > { %6545 = vst [vmem:[#allocation33_spill] sm:$0xff] %v5813_v39  ;;  %v1715_v53 = vadd.f32 %v3923_v45, %v6546_v56  ;;  %v1675_v9 = vpop.f32.mrb[31].mxu0  ;;  %4513 = vmatprep.subr.bf16.mxu1 %v4512_v41  ;;  %v1768_v29 = vmul.f32 %v5873_v10, %v1759_v26  ;;  %v1741_v56 = vrot.slane %v5797_v49, 7  ;;  %v1745_v59 = vrot.slane %v5813_v39, 7  ;;  %v5944_v17 = vld [vmem:[%s6402_s1 + $0x60] sm:$0xff] }
 0x35d   : > { %6544 = vst [vmem:[#allocation32_spill] sm:$0xff] %v5811_v35  ;;  %v1714_v31 = vadd.f32 %v1675_v9, %v6547_v6  ;;  %3974 = vmatprep.mubr.f32.mxu1 %v5811_v35  ;;  %v1742_v6 = vrot.slane %v5803_v14, 7 }
 0x35e   : > { %v5821_v21 = vmax.f32 %v1715_v53, 0.0  ;;  %3975 = vmatmul.mubr.f32.gmra.mrb[28].mxu1 %v5813_v39  ;;  %v5891_v53 = vld [vmem:[%s6402_s1 + $0x30] sm:$0xff]  ;;  %v1754_v1 = vsel %vm503_vm1, %v1740_v40, %v1741_v56 }
 0x35f   : > { %v5824_v11 = vmax.f32 %v1714_v31, 0.0  ;;  %4515 = vmatpush3.bf16.msra.mxu1 %v4512_v41  ;;  %v2160_v41 = vld [vmem:[#allocation3 + $0x438] sm:$0xff]  ;;  %v1770_v9 = vmul.f32 %v5891_v53, %v1757_v54  ;;  %v1755_v31 = vsel %vm503_vm1, %v1739_v34, %v1740_v40  ;;  %v1753_v22 = vsel %vm503_vm1, %v1741_v56, %v1742_v6  ;;  %v2167_v40 = vld [vmem:[#allocation3 + $0x470] sm:$0xff] }
 0x360   : > { %6548 = vst [vmem:[#allocation9_spill] sm:$0xff] %v5821_v21  ;;  %v1747_v23 = vrot.slane %v5821_v21, 7  ;;  %4517 = vmatprep.subr.bf16.mxu1 %v4516_v5  ;;  %v4532_v45 = vpack.c.bf16 %v2160_v41, %v2159_v30  ;;  %v1772_v33 = vmul.f32 %v5909_v46, %v1755_v31  ;;  %v2168_v54 = vld [vmem:[#allocation3 + $0x478] sm:$0xff] }
 0x361   : > { %6549 = vst [vmem:[#allocation10_spill] sm:$0xff] %v5824_v11  ;;  %3977 = vmatprep.mubr.f32.mxu1 %v5824_v11  ;;  %v1746_v26 = vrot.slane %v5824_v11, 7 }
 0x362   : > { %3978 = vmatmul.mubr.f32.gmra.mrb[30].mxu1 %v5821_v21  ;;  %v1763_v25 = vsel %vm503_vm1, %v1747_v23, %v1732_v52  ;;  %v2162_v52 = vld [vmem:[#allocation3 + $0x448] sm:$0xff] }
 0x363   : > { %4519 = vmatpush3.bf16.msra.mxu1 %v4516_v5  ;;  %v1764_v57 = vmul.f32 %v5842_v38, %v1763_v25  ;;  %v1756_v5 = vsel %vm503_vm1, %v1738_v60, %v1739_v34  ;;  %v4536_v32 = vpack.c.bf16 %v2162_v52, %v2161_v2  ;;  %v1744_v25 = vrot.slane %v5811_v35, 7  ;;  %v2166_v60 = vld [vmem:[#allocation3 + $0x468] sm:$0xff] }
 0x364   : > { %4521 = vmatprep.subr.bf16.mxu1 %v4520_v51  ;;  %v1771_v28 = vmul.f32 %v5902_v36, %v1756_v5  ;;  %v1749_v56 = vsel %vm503_vm1, %v1745_v59, %v1746_v26  ;;  %v4548_v2 = vpack.c.bf16 %v2168_v54, %v2167_v40  ;;  %v1782_v52 = vrot.slane %v5771_v50, 1 }
 0x365   : > { %4012 = vmatprep.mubr.f32.mxu1 %v1764_v57  ;;  %v5920_v57 = vld [vmem:[%s6402_s1 + $0x48] sm:$0xff]  ;;  %v1750_v41 = vsel %vm503_vm1, %v1744_v25, %v1745_v59 }
 0x366   : > { %4013 = vmatmul.mubr.f32.vlgmr.msra.gmra.mrb[16].mxu1 %v1765_v58  ;;  %v1773_v58 = vmul.f32 %v5920_v57, %v1754_v1 }
 0x367   : > { %4523 = vmatpush3.bf16.msra.mxu1 %v4520_v51  ;;  %4015 = vmatprep.mubr.f32.mxu1 %v1766_v16  ;;  %v1743_v51 = vrot.slane %v5805_v61, 7  ;;  %v5927_v16 = vld [vmem:[%s6402_s1 + $0x50] sm:$0xff] }
 0x368   : > { %4525 = vmatprep.subr.bf16.mxu1 %v4524_v44  ;;  %v1774_v24 = vmul.f32 %v5927_v16, %v1753_v22  ;;  %v1785_v22 = vrot.slane %v5781_v63, 1 }
 0x369   : > { %v1752_v15 = vsel %vm503_vm1, %v1742_v6, %v1743_v51  ;;  %v5963_v6 = vld [vmem:[%s6402_s1 + $0x70] sm:$0xff] }
 0x36a   : > { %4016 = vmatmul.mubr.f32.gmra.mrb[18].mxu1 %v1767_v48  ;;  %v1751_v48 = vsel %vm503_vm1, %v1743_v51, %v1744_v25  ;;  %v1778_v31 = vmul.f32 %v5963_v6, %v1749_v56 }
 0x36b   : > { %4527 = vmatpush3.bf16.msra.mxu1 %v4524_v44  ;;  %4018 = vmatprep.mubr.f32.mxu1 %v1768_v29  ;;  %v4540_v44 = vpack.c.bf16 %v2164_v37, %v2163_v3  ;;  %v4544_v29 = vpack.c.bf16 %v2166_v60, %v2165_v0  ;;  %v1776_v30 = vmul.f32 %v5944_v17, %v1751_v48  ;;  %v5985_v3 = vld [vmem:[%s6403_s2] sm:$0xff] }
 0x36c   : > { %4529 = vmatprep.subr.bf16.mxu1 %v4528_v13 }
 0x36e   : > { %4019 = vmatmul.mubr.f32.gmra.mrb[20].mxu1 %v1769_v12  ;;  %v1781_v12 = vrot.slane %v5765_v55, 1 }
 0x36f   : > { %4531 = vmatpush3.bf16.msra.mxu1 %v4528_v13  ;;  %4021 = vmatprep.mubr.f32.mxu1 %v1770_v9  ;;  %v5938_v13 = vld [vmem:[%s6402_s1 + $0x58] sm:$0xff]  ;;  %v5956_v9 = vld [vmem:[%s6402_s1 + $0x68] sm:$0xff] }
 0x370   : > { %4533 = vmatprep.subr.bf16.mxu1 %v4532_v45  ;;  %v1775_v34 = vmul.f32 %v5938_v13, %v1752_v15  ;;  %v1777_v5 = vmul.f32 %v5956_v9, %v1750_v41  ;;  %v1809_v25 = vsel %vm552_vm2, %v1781_v12, %v1782_v52  ;;  %v6003_v15 = vld [vmem:[%s6403_s2 + $0x10] sm:$0xff]  ;;  %v6021_v41 = vld [vmem:[%s6403_s2 + $0x20] sm:$0xff] }
 0x372   : > { %4022 = vmatmul.mubr.f32.gmra.mrb[22].mxu1 %v1771_v28  ;;  %v1748_v28 = vsel %vm503_vm1, %v1746_v26, %v1747_v23  ;;  %v1784_v23 = vrot.slane %v5779_v27, 1  ;;  %v1787_v26 = vrot.slane %v5789_v8, 1  ;;  %v2452_v27 = vld [vmem:[#allocation3 + $0x4c8] sm:$0xff] }
 0x373   : > { %4535 = vmatpush3.bf16.msra.mxu1 %v4532_v45  ;;  %4024 = vmatprep.mubr.f32.mxu1 %v1772_v33  ;;  %v1780_v45 = vrot.slane %v5763_v42, 1  ;;  %v5978_v33 = vld [vmem:[%s6402_s1 + $0x78] sm:$0xff] }
 0x374   : > { %4537 = vmatprep.subr.bf16.mxu1 %v4536_v32  ;;  %v1779_v1 = vmul.f32 %v5978_v33, %v1748_v28  ;;  %v1806_v48 = vsel %vm552_vm2, %v1784_v23, %v1785_v22 }
 0x375   : > { %v1810_v51 = vsel %vm552_vm2, %v1780_v45, %v1781_v12  ;;  %v1816_v40 = vmul.f32 %v6021_v41, %v1806_v48  ;;  %v1789_v12 = vrot.slane %v5797_v49, 1  ;;  %v1794_v48 = vrot.slane %v5824_v11, 1 }
 0x376   : > { %4025 = vmatmul.mubr.f32.gmra.mrb[24].mxu1 %v1773_v58  ;;  %v1812_v37 = vmul.f32 %v5985_v3, %v1810_v51  ;;  %v1791_v51 = vrot.slane %v5805_v61, 1  ;;  %v2449_v61 = vld [vmem:[#allocation3 + $0x4b0] sm:$0xff] }
 0x377   : > { %4539 = vmatpush3.bf16.msra.mxu1 %v4536_v32  ;;  %4027 = vmatprep.mubr.f32.mxu1 %v1774_v24  ;;  %v1783_v32 = vrot.slane %v5773_v18, 1  ;;  %v1786_v24 = vrot.slane %v5787_v47, 1  ;;  %v2454_v18 = vld [vmem:[#allocation3 + $0x4d8] sm:$0xff] }
 0x378   : > { %4541 = vmatprep.subr.bf16.mxu1 %v4540_v44 }
 0x379   : > { %v1808_v58 = vsel %vm552_vm2, %v1782_v52, %v1783_v32  ;;  %v1807_v60 = vsel %vm552_vm2, %v1783_v32, %v1784_v23  ;;  %v1805_v54 = vsel %vm552_vm2, %v1785_v22, %v1786_v24  ;;  %v1804_v56 = vsel %vm552_vm2, %v1786_v24, %v1787_v26  ;;  %v6050_v23 = vld [vmem:[%s6403_s2 + $0x38] sm:$0xff]  ;;  %v6057_v22 = vld [vmem:[%s6403_s2 + $0x40] sm:$0xff] }
 0x37a   : > { %4028 = vmatmul.mubr.f32.gmra.mrb[26].mxu1 %v1775_v34  ;;  %v1814_v0 = vmul.f32 %v6003_v15, %v1808_v58  ;;  %v6014_v34 = vld [vmem:[%s6403_s2 + $0x18] sm:$0xff]  ;;  %v1790_v52 = vrot.slane %v5803_v14, 1  ;;  %6551 = vst [vmem:[#allocation12_spill] sm:$0xff] %v6050_v23  ;;  %6552 = vst [vmem:[#allocation13_spill] sm:$0xff] %v6057_v22  ;;  %v1793_v24 = vrot.slane %v5813_v39, 1 }
 0x37b   : > { %4543 = vmatpush3.bf16.msra.mxu1 %v4540_v44  ;;  %4030 = vmatprep.mubr.f32.mxu1 %v1776_v30  ;;  %v5996_v44 = vld [vmem:[%s6403_s2 + $0x8] sm:$0xff]  ;;  %v1788_v30 = vrot.slane %v5795_v19, 1  ;;  %v2450_v19 = vld [vmem:[#allocation3 + $0x4b8] sm:$0xff] }
 0x37c   : > { %4545 = vmatprep.subr.bf16.mxu1 %v4544_v29  ;;  %v1813_v59 = vmul.f32 %v5996_v44, %v1809_v25  ;;  %v1792_v25 = vrot.slane %v5811_v35, 1 }
 0x37d   : > { %v1803_v32 = vsel %vm552_vm2, %v1787_v26, %v1788_v30 }
 0x37e   : > { %4031 = vmatmul.mubr.f32.gmra.mrb[28].mxu1 %v1777_v5  ;;  %v6032_v5 = vld [vmem:[%s6403_s2 + $0x28] sm:$0xff] }
 0x37f   : > { %4547 = vmatpush3.bf16.msra.mxu1 %v4544_v29  ;;  %4033 = vmatprep.mubr.f32.mxu1 %v1778_v31  ;;  %v1815_v29 = vmul.f32 %v6014_v34, %v1807_v60  ;;  %v6039_v31 = vld [vmem:[%s6403_s2 + $0x30] sm:$0xff]  ;;  %v6068_v60 = vld [vmem:[%s6403_s2 + $0x48] sm:$0xff] }
 0x380   : > { %4549 = vmatprep.subr.bf16.mxu1 %v4548_v2  ;;  %6550 = vst [vmem:[#allocation11_spill] sm:$0xff] %v6039_v31  ;;  %v1818_v28 = vmul.f32 %v6039_v31, %v1804_v56  ;;  %6553 = vst [vmem:[#allocation14_spill] sm:$0xff] %v6068_v60  ;;  %v6086_v56 = vld [vmem:[%s6403_s2 + $0x58] sm:$0xff] }
 0x381   : > { %6555 = vst [vmem:[#allocation16_spill] sm:$0xff] %v6086_v56 }
 0x382   : > { %4034 = vmatmul.mubr.f32.gmra.mrb[30].mxu1 %v1779_v1  ;;  %v1802_v1 = vsel %vm552_vm2, %v1788_v30, %v1789_v12 }
 0x383   : > { %4551 = vmatpush3.bf16.msra.mxu1 %v4548_v2  ;;  %4068 = vmatprep.mubr.f32.mxu1 %v1812_v37  ;;  %v1817_v2 = vmul.f32 %v6032_v5, %v1805_v54  ;;  %v1819_v37 = vmul.f32 %v6050_v23, %v1803_v32  ;;  %v1820_v58 = vmul.f32 %v6057_v22, %v1802_v1  ;;  %v1795_v54 = vrot.slane %v5821_v21, 1  ;;  %v6102_v1 = vld [vmem:[%s6403_s2 + $0x68] sm:$0xff] }
 0x384   : > { %v1797_v32 = vsel %vm552_vm2, %v1793_v24, %v1794_v48  ;;  %6557 = vst [vmem:[#allocation18_spill] sm:$0xff] %v6102_v1  ;;  %v2768_v23 = vld [vmem:[#allocation3 + $0x588] sm:$0xff] }
 0x386   : > { %4069 = vmatmul.mubr.f32.vlgmr.msra.gmra.mrb[16].mxu1 %v1813_v59  ;;  %v1801_v59 = vsel %vm552_vm2, %v1789_v12, %v1790_v52  ;;  %v1798_v12 = vsel %vm552_vm2, %v1792_v25, %v1793_v24  ;;  %v6118_v24 = vld [vmem:[%s6403_s2 + $0x78] sm:$0xff] }
 0x387   : > { %4071 = vmatprep.mubr.f32.mxu1 %v1814_v0  ;;  %v1800_v0 = vsel %vm552_vm2, %v1790_v52, %v1791_v51  ;;  %v1821_v26 = vmul.f32 %v6068_v60, %v1801_v59  ;;  %v6092_v52 = vld [vmem:[%s6403_s2 + $0x60] sm:$0xff]  ;;  %v1811_v59 = vsel %vm552_vm2, %v1795_v54, %v1780_v45  ;;  %6559 = vst [vmem:[#allocation20_spill] sm:$0xff] %v6118_v24 }
 0x388   : > { %6556 = vst [vmem:[#allocation17_spill] sm:$0xff] %v6092_v52 }
 0x38a   : > { %4072 = vmatmul.mubr.f32.gmra.mrb[18].mxu1 %v1815_v29  ;;  %v6075_v29 = vld [vmem:[%s6403_s2 + $0x50] sm:$0xff] }
 0x38b   : > { %4074 = vmatprep.mubr.f32.mxu1 %v1816_v40  ;;  %6554 = vst [vmem:[#allocation15_spill] sm:$0xff] %v6075_v29  ;;  %v1822_v30 = vmul.f32 %v6075_v29, %v1800_v0  ;;  %v1799_v40 = vsel %vm552_vm2, %v1791_v51, %v1792_v25  ;;  %v1796_v51 = vsel %vm552_vm2, %v1794_v48, %v1795_v54  ;;  %v6108_v25 = vld [vmem:[%s6403_s2 + $0x70] sm:$0xff]  ;;  %v2475_v48 = vld [vmem:[#allocation3 + $0x578] sm:$0xff] }
 0x38c   : > { %6558 = vst [vmem:[#allocation19_spill] sm:$0xff] %v6108_v25  ;;  %v1827_v0 = vmul.f32 %v6118_v24, %v1811_v59  ;;  %v2445_v54 = vld [vmem:[#allocation3 + $0x490] sm:$0xff]  ;;  %v2458_v29 = vld [vmem:[#allocation3 + $0x4f8] sm:$0xff] }
 0x38e   : > { %4075 = vmatmul.mubr.f32.gmra.mrb[20].mxu1 %v1817_v2  ;;  %v1823_v2 = vmul.f32 %v6086_v56, %v1799_v40  ;;  %v2443_v40 = vld [vmem:[#allocation3 + $0x480] sm:$0xff] }
 0x38f   : > { %4077 = vmatprep.mubr.f32.mxu1 %v1818_v28  ;;  %v1824_v28 = vmul.f32 %v6092_v52, %v1798_v12  ;;  %v2444_v12 = vld [vmem:[#allocation3 + $0x488] sm:$0xff] }
 0x392   : > { %4078 = vmatmul.mubr.f32.gmra.mrb[22].mxu1 %v1819_v37  ;;  %v1825_v37 = vmul.f32 %v6102_v1, %v1797_v32 }
 0x393   : > { %4080 = vmatprep.mubr.f32.mxu1 %v1820_v58  ;;  %v1826_v58 = vmul.f32 %v6108_v25, %v1796_v51  ;;  %v2456_v25 = vld [vmem:[#allocation3 + $0x4e8] sm:$0xff] }
 0x396   : > { %4081 = vmatmul.mubr.f32.gmra.mrb[24].mxu1 %v1821_v26  ;;  %v2474_v26 = vld [vmem:[#allocation3 + $0x570] sm:$0xff] }
 0x397   : > { %4083 = vmatprep.mubr.f32.mxu1 %v1822_v30  ;;  %v4580_v30 = vpack.c.bf16 %v2475_v48, %v2474_v26 }
 0x399   : > { %4581 = vmatprep.subr.bf16.mxu0 %v4580_v30 }
 0x39a   : > { %4084 = vmatmul.mubr.f32.gmra.mrb[26].mxu1 %v1823_v2  ;;  %4583 = vmatpush3.bf16.msra.mxu0 %v4580_v30  ;;  %v4584_v2 = vpack.c.bf16 %v2444_v12, %v2443_v40  ;;  %v2447_v30 = vld [vmem:[#allocation3 + $0x4a0] sm:$0xff]  ;;  %v2448_v40 = vld [vmem:[#allocation3 + $0x4a8] sm:$0xff] }
 0x39b   : > { %4086 = vmatprep.mubr.f32.mxu1 %v1824_v28  ;;  %v2446_v28 = vld [vmem:[#allocation3 + $0x498] sm:$0xff]  ;;  %v4592_v35 = vpack.c.bf16 %v2448_v40, %v2447_v30 }
 0x39c   : > { %4585 = vmatprep.subr.bf16.mxu0 %v4584_v2  ;;  %v4588_v59 = vpack.c.bf16 %v2446_v28, %v2445_v54 }
 0x39e   : > { %4087 = vmatmul.mubr.f32.gmra.mrb[28].mxu1 %v1825_v37 }
 0x39f   : > { %4089 = vmatprep.mubr.f32.mxu1 %v1826_v58 }
 0x3a2   : > { %4090 = vmatmul.mubr.f32.gmra.mrb[30].mxu1 %v1827_v0 }
 0x459   : > { %v4070_v45 = vpop.f32.mrb[16].mxu1 }
 0x45a   : > { %v2331_v32 = vmax.f32 %v4070_v45, 0.0  ;;  %v2235_v51 = vpop.f32.mrb[17].mxu1 }
 0x45b   : > { %v6121_v37 = vmax.f32 %v2235_v51, 0.0 }
 0x45c   : > { %v2347_v58 = vrot.slane %v2331_v32, 7  ;;  %v2395_v11 = vrot.slane %v2331_v32, 1 }
 0x45d   : > { %v6444_v0 = vrot.slane %v6121_v37, 7  ;;  %v6446_v26 = vrot.slane %v6121_v37, 1  ;;  %v4073_v48 = vpop.f32.mrb[18].mxu1  ;;  %4124 = vmatprep.mubr.f32.mxu0 %v6121_v37 }
 0x45e   : > { %v2333_v12 = vmax.f32 %v4073_v48, 0.0  ;;  %v2245_v21 = vpop.f32.mrb[19].mxu1  ;;  %4125 = vmatmul.mubr.f32.vlgmr.msra.gmra.mrb[32].mxu0 %v2331_v32 }
 0x45f   : > { %v6130_v45 = vsel %vm503_vm1, %v6444_v0, %v2347_v58  ;;  %v2332_v51 = vmax.f32 %v2245_v21, 0.0  ;;  %4587 = vmatpush3.bf16.msra.mxu0 %v4584_v2  ;;  %v6136_v54 = vsel %vm552_vm2, %v6446_v26, %v2395_v11 }
 0x460   : > { %v2349_v28 = vrot.slane %v2333_v12, 7  ;;  %4589 = vmatprep.subr.bf16.mxu0 %v4588_v59  ;;  %v2397_v48 = vrot.slane %v2333_v12, 1 }
 0x461   : > { %v2348_v39 = vrot.slane %v2332_v51, 7  ;;  %v2396_v32 = vrot.slane %v2332_v51, 1  ;;  %v4076_v14 = vpop.f32.mrb[20].mxu1  ;;  %4127 = vmatprep.mubr.f32.mxu0 %v2332_v51  ;;  %v4596_v51 = vpack.c.bf16 %v2450_v19, %v2449_v61 }
 0x462   : > { %v2335_v0 = vmax.f32 %v4076_v14, 0.0  ;;  %v2255_v49 = vpop.f32.mrb[21].mxu1  ;;  %4128 = vmatmul.mubr.f32.gmra.mrb[34].mxu0 %v2333_v12 }
 0x463   : > { %v6140_v21 = vsel %vm552_vm2, %v2395_v11, %v2396_v32  ;;  %v2334_v2 = vmax.f32 %v2255_v49, 0.0  ;;  %4591 = vmatpush3.bf16.msra.mxu0 %v4588_v59  ;;  %v6144_v26 = vsel %vm503_vm1, %v2347_v58, %v2348_v39  ;;  %v6148_v30 = vsel %vm503_vm1, %v2348_v39, %v2349_v28  ;;  %v2451_v11 = vld [vmem:[#allocation3 + $0x4c0] sm:$0xff] }
 0x464   : > { %v2351_v40 = vrot.slane %v2335_v0, 7  ;;  %4593 = vmatprep.subr.bf16.mxu0 %v4592_v35  ;;  %v2399_v14 = vrot.slane %v2335_v0, 1  ;;  %v6152_v49 = vsel %vm552_vm2, %v2396_v32, %v2397_v48  ;;  %v4600_v32 = vpack.c.bf16 %v2452_v27, %v2451_v11 }
 0x465   : > { %v2350_v47 = vrot.slane %v2334_v2, 7  ;;  %v2398_v12 = vrot.slane %v2334_v2, 1  ;;  %v4079_v8 = vpop.f32.mrb[22].mxu1  ;;  %4130 = vmatprep.mubr.f32.mxu0 %v2334_v2 }
 0x466   : > { %v2337_v58 = vmax.f32 %v4079_v8, 0.0  ;;  %v2265_v59 = vpop.f32.mrb[23].mxu1  ;;  %4131 = vmatmul.mubr.f32.gmra.mrb[36].mxu0 %v2335_v0 }
 0x467   : > { %v2336_v63 = vmax.f32 %v2265_v59, 0.0  ;;  %4595 = vmatpush3.bf16.msra.mxu0 %v4592_v35  ;;  %v6156_v39 = vsel %vm503_vm1, %v2349_v28, %v2350_v47  ;;  %v6160_v19 = vsel %vm503_vm1, %v2350_v47, %v2351_v40  ;;  %v6164_v61 = vsel %vm552_vm2, %v2397_v48, %v2398_v12  ;;  %v2453_v35 = vld [vmem:[#allocation3 + $0x4d0] sm:$0xff] }
 0x468   : > { %v2353_v2 = vrot.slane %v2337_v58, 7  ;;  %4597 = vmatprep.subr.bf16.mxu0 %v4596_v51  ;;  %v2401_v8 = vrot.slane %v2337_v58, 1  ;;  %v6168_v28 = vsel %vm552_vm2, %v2398_v12, %v2399_v14  ;;  %v4604_v12 = vpack.c.bf16 %v2454_v18, %v2453_v35 }
 0x469   : > { %v2352_v50 = vrot.slane %v2336_v63, 7  ;;  %v2400_v0 = vrot.slane %v2336_v63, 1  ;;  %v4082_v59 = vpop.f32.mrb[24].mxu1  ;;  %4133 = vmatprep.mubr.f32.mxu0 %v2336_v63 }
 0x46a   : > { %v2339_v47 = vmax.f32 %v4082_v59, 0.0  ;;  %v2275_v42 = vpop.f32.mrb[25].mxu1  ;;  %4134 = vmatmul.mubr.f32.gmra.mrb[38].mxu0 %v2337_v58 }
 0x46b   : > { %v2338_v55 = vmax.f32 %v2275_v42, 0.0  ;;  %4599 = vmatpush3.bf16.msra.mxu0 %v4596_v51  ;;  %v6172_v48 = vsel %vm503_vm1, %v2351_v40, %v2352_v50  ;;  %v6176_v27 = vsel %vm503_vm1, %v2352_v50, %v2353_v2  ;;  %v6180_v63 = vsel %vm552_vm2, %v2399_v14, %v2400_v0  ;;  %v2455_v51 = vld [vmem:[#allocation3 + $0x4e0] sm:$0xff] }
 0x46c   : > { %v2355_v11 = vrot.slane %v2339_v47, 7  ;;  %4601 = vmatprep.subr.bf16.mxu0 %v4600_v32  ;;  %v2403_v59 = vrot.slane %v2339_v47, 1  ;;  %v6184_v40 = vsel %vm552_vm2, %v2400_v0, %v2401_v8  ;;  %v4608_v0 = vpack.c.bf16 %v2456_v25, %v2455_v51 }
 0x46d   : > { %v2354_v24 = vrot.slane %v2338_v55, 7  ;;  %v2402_v58 = vrot.slane %v2338_v55, 1  ;;  %v4085_v42 = vpop.f32.mrb[26].mxu1  ;;  %4136 = vmatprep.mubr.f32.mxu0 %v2338_v55 }
 0x46e   : > { %v2341_v50 = vmax.f32 %v4085_v42, 0.0  ;;  %v2285_v1 = vpop.f32.mrb[27].mxu1  ;;  %4137 = vmatmul.mubr.f32.gmra.mrb[40].mxu0 %v2339_v47 }
 0x46f   : > { %v2340_v52 = vmax.f32 %v2285_v1, 0.0  ;;  %4603 = vmatpush3.bf16.msra.mxu0 %v4600_v32  ;;  %v6188_v14 = vsel %vm503_vm1, %v2353_v2, %v2354_v24  ;;  %v6192_v18 = vsel %vm503_vm1, %v2354_v24, %v2355_v11  ;;  %v6196_v55 = vsel %vm552_vm2, %v2401_v8, %v2402_v58  ;;  %v2457_v32 = vld [vmem:[#allocation3 + $0x4f0] sm:$0xff] }
 0x470   : > { %6560 = vst [vmem:[#allocation21_spill] sm:$0xff] %v6196_v55  ;;  %v2357_v35 = vrot.slane %v2341_v50, 7  ;;  %4605 = vmatprep.subr.bf16.mxu0 %v4604_v12  ;;  %v2405_v42 = vrot.slane %v2341_v50, 1  ;;  %v6200_v2 = vsel %vm552_vm2, %v2402_v58, %v2403_v59  ;;  %v4612_v58 = vpack.c.bf16 %v2458_v29, %v2457_v32 }
 0x471   : > { %v2356_v56 = vrot.slane %v2340_v52, 7  ;;  %v2404_v47 = vrot.slane %v2340_v52, 1  ;;  %v4088_v1 = vpop.f32.mrb[28].mxu1  ;;  %4139 = vmatprep.mubr.f32.mxu0 %v2340_v52  ;;  %6561 = vst [vmem:[#allocation22_spill] sm:$0xff] %v6200_v2 }
 0x472   : > { %v2343_v24 = vmax.f32 %v4088_v1, 0.0  ;;  %v2295_v60 = vpop.f32.mrb[29].mxu1  ;;  %4140 = vmatmul.mubr.f32.gmra.mrb[42].mxu0 %v2341_v50 }
 0x473   : > { %v2342_v22 = vmax.f32 %v2295_v60, 0.0  ;;  %4607 = vmatpush3.bf16.msra.mxu0 %v4604_v12  ;;  %v6204_v8 = vsel %vm503_vm1, %v2355_v11, %v2356_v56  ;;  %v6208_v25 = vsel %vm503_vm1, %v2356_v56, %v2357_v35  ;;  %v6212_v52 = vsel %vm552_vm2, %v2403_v59, %v2404_v47  ;;  %v2767_v12 = vld [vmem:[#allocation3 + $0x580] sm:$0xff] }
 0x474   : > { %v2359_v51 = vrot.slane %v2343_v24, 7  ;;  %4609 = vmatprep.subr.bf16.mxu0 %v4608_v0  ;;  %v2407_v1 = vrot.slane %v2343_v24, 1  ;;  %v6216_v11 = vsel %vm552_vm2, %v2404_v47, %v2405_v42 }
 0x475   : > { %v2358_v2 = vrot.slane %v2342_v22, 7  ;;  %v2406_v50 = vrot.slane %v2342_v22, 1  ;;  %v4091_v60 = vpop.f32.mrb[30].mxu1  ;;  %4142 = vmatprep.mubr.f32.mxu0 %v2342_v22  ;;  %6562 = vst [vmem:[#allocation23_spill] sm:$0xff] %v6216_v11 }
 0x476   : > { %v2345_v56 = vmax.f32 %v4091_v60, 0.0  ;;  %v2305_v55 = vpop.f32.mrb[31].mxu1  ;;  %4143 = vmatmul.mubr.f32.gmra.mrb[44].mxu0 %v2343_v24  ;;  %v4616_v60 = vpack.c.bf16 %v2768_v23, %v2767_v12 }
 0x477   : > { %v2344_v31 = vmax.f32 %v2305_v55, 0.0  ;;  %4611 = vmatpush3.bf16.msra.mxu0 %v4608_v0  ;;  %v6220_v59 = vsel %vm503_vm1, %v2357_v35, %v2358_v2  ;;  %v6224_v29 = vsel %vm503_vm1, %v2358_v2, %v2359_v51  ;;  %v6228_v22 = vsel %vm552_vm2, %v2405_v42, %v2406_v50  ;;  %v2769_v55 = vld [vmem:[#allocation3 + $0x590] sm:$0xff]  ;;  %v2770_v0 = vld [vmem:[#allocation3 + $0x598] sm:$0xff] }
 0x478   : > { %6563 = vst [vmem:[#allocation24_spill] sm:$0xff] %v6228_v22  ;;  %v2361_v32 = vrot.slane %v2345_v56, 7  ;;  %v2409_v47 = vrot.slane %v2345_v56, 1  ;;  %4613 = vmatprep.subr.bf16.mxu0 %v4612_v58  ;;  %v6232_v35 = vsel %vm552_vm2, %v2406_v50, %v2407_v1  ;;  %v6564_v2 = vrot.slane %v6121_v37, 7 }
 0x479   : > { %v2360_v11 = vrot.slane %v2344_v31, 7  ;;  %v2408_v24 = vrot.slane %v2344_v31, 1  ;;  %4145 = vmatprep.mubr.f32.mxu0 %v2344_v31  ;;  %v6565_v22 = vrot.slane %v6121_v37, 1  ;;  %v2379_v37 = vmul.f32 %v5848_v43, %v6130_v45 }
 0x47a   : > { %4146 = vmatmul.mubr.f32.gmra.mrb[46].mxu0 %v2345_v56  ;;  %v2377_v42 = vsel %vm503_vm1, %v2361_v32, %v6564_v2  ;;  %v2382_v45 = vmul.f32 %v5873_v10, %v6156_v39  ;;  %v2777_v39 = vld [vmem:[#allocation3 + $0x5d0] sm:$0xff]  ;;  %v2782_v2 = vld [vmem:[#allocation3 + $0x5f8] sm:$0xff] }
 0x47b   : > { %v6242_v23 = vsel %vm552_vm2, %v2409_v47, %v6565_v22  ;;  %4615 = vmatpush3.bf16.msra.mxu0 %v4612_v58  ;;  %v2378_v31 = vmul.f32 %v5842_v38, %v2377_v42  ;;  %v2363_v12 = vsel %vm503_vm1, %v2359_v51, %v2360_v11  ;;  %v6249_v50 = vsel %vm503_vm1, %v2360_v11, %v2361_v32  ;;  %v2771_v51 = vld [vmem:[#allocation3 + $0x5a0] sm:$0xff]  ;;  %v2772_v11 = vld [vmem:[#allocation3 + $0x5a8] sm:$0xff]  ;;  %v2774_v32 = vld [vmem:[#allocation3 + $0x5b8] sm:$0xff] }
 0x47c   : > { %v6253_v56 = vsel %vm552_vm2, %v2407_v1, %v2408_v24  ;;  %4617 = vmatprep.subr.bf16.mxu0 %v4616_v60  ;;  %v4620_v22 = vpack.c.bf16 %v2770_v0, %v2769_v55  ;;  %v6259_v58 = vsel %vm552_vm2, %v2408_v24, %v2409_v47  ;;  %v2380_v38 = vmul.f32 %v5855_v7, %v6144_v26  ;;  %v2776_v24 = vld [vmem:[#allocation3 + $0x5c8] sm:$0xff]  ;;  %v2778_v55 = vld [vmem:[#allocation3 + $0x5d8] sm:$0xff] }
 0x47d   : > { %4180 = vmatprep.mubr.f32.mxu0 %v2378_v31  ;;  %v2381_v1 = vmul.f32 %v5866_v62, %v6148_v30  ;;  %v4624_v43 = vpack.c.bf16 %v2772_v11, %v2771_v51  ;;  %v2383_v7 = vmul.f32 %v5884_v20, %v6160_v19  ;;  %v4628_v26 = vpack.c.bf16 %v2774_v32, %v2773_v4  ;;  %v2780_v0 = vld [vmem:[#allocation3 + $0x5e8] sm:$0xff]  ;;  %v6576_v31 = vld [vmem:[#allocation17_spill] sm:$0xff] }
 0x47e   : > { %4181 = vmatmul.mubr.f32.vlgmr.msra.gmra.mrb[32].mxu0 %v2379_v37  ;;  %v2384_v47 = vmul.f32 %v5891_v53, %v6172_v48  ;;  %v2385_v62 = vmul.f32 %v5902_v36, %v6176_v27  ;;  %v2386_v30 = vmul.f32 %v5909_v46, %v6188_v14  ;;  %v2387_v20 = vmul.f32 %v5920_v57, %v6192_v18  ;;  %v2779_v48 = vld [vmem:[#allocation3 + $0x5e0] sm:$0xff]  ;;  %v2781_v14 = vld [vmem:[#allocation3 + $0x5f0] sm:$0xff] }
 0x47f   : > { %4619 = vmatpush3.bf16.msra.mxu0 %v4616_v60  ;;  %4183 = vmatprep.mubr.f32.mxu0 %v2380_v38  ;;  %v2775_v60 = vld [vmem:[#allocation3 + $0x5c0] sm:$0xff]  ;;  %v4636_v53 = vpack.c.bf16 %v2778_v55, %v2777_v39  ;;  %v2388_v19 = vmul.f32 %v5927_v16, %v6204_v8  ;;  %v2389_v36 = vmul.f32 %v5938_v13, %v6208_v25 }
 0x480   : > { %4621 = vmatprep.subr.bf16.mxu0 %v4620_v22  ;;  %v4632_v10 = vpack.c.bf16 %v2776_v24, %v2775_v60  ;;  %v4640_v46 = vpack.c.bf16 %v2780_v0, %v2779_v48  ;;  %v2390_v27 = vmul.f32 %v5944_v17, %v6220_v59  ;;  %v2391_v57 = vmul.f32 %v5956_v9, %v6224_v29  ;;  %v6570_v59 = vld [vmem:[#allocation13_spill] sm:$0xff]  ;;  %v6583_v60 = vld [vmem:[#allocation35_spill] sm:$0xff] }
 0x481   : > { %v4644_v16 = vpack.c.bf16 %v2782_v2, %v2781_v14  ;;  %v2392_v18 = vmul.f32 %v5963_v6, %v2363_v12  ;;  %v2393_v13 = vmul.f32 %v5978_v33, %v6249_v50  ;;  %v2426_v17 = vmul.f32 %v5985_v3, %v6136_v54  ;;  %v6566_v54 = vld [vmem:[#allocation11_spill] sm:$0xff]  ;;  %v6577_v50 = vld [vmem:[#allocation18_spill] sm:$0xff] }
 0x482   : > { %4184 = vmatmul.mubr.f32.gmra.mrb[34].mxu0 %v2381_v1  ;;  %v2427_v8 = vmul.f32 %v5996_v44, %v6140_v21  ;;  %v2428_v9 = vmul.f32 %v6003_v15, %v6152_v49  ;;  %v2429_v6 = vmul.f32 %v6014_v34, %v6164_v61  ;;  %v2430_v33 = vmul.f32 %v6021_v41, %v6168_v28  ;;  %v6567_v44 = vld [vmem:[#allocation21_spill] sm:$0xff]  ;;  %v6568_v15 = vld [vmem:[#allocation12_spill] sm:$0xff]  ;;  %v6569_v49 = vld [vmem:[#allocation22_spill] sm:$0xff] }
 0x483   : > { %4623 = vmatpush3.bf16.msra.mxu0 %v4620_v22  ;;  %4186 = vmatprep.mubr.f32.mxu0 %v2382_v45  ;;  %v2431_v3 = vmul.f32 %v6032_v5, %v6180_v63  ;;  %v2432_v25 = vmul.f32 %v6566_v54, %v6184_v40  ;;  %v2433_v21 = vmul.f32 %v6568_v15, %v6567_v44  ;;  %v6571_v34 = vld [vmem:[#allocation14_spill] sm:$0xff]  ;;  %v6572_v61 = vld [vmem:[#allocation23_spill] sm:$0xff]  ;;  %v6574_v5 = vld [vmem:[#allocation24_spill] sm:$0xff] }
 0x484   : > { %4625 = vmatprep.subr.bf16.mxu0 %v4624_v43  ;;  %v2434_v29 = vmul.f32 %v6570_v59, %v6569_v49  ;;  %v2435_v41 = vmul.f32 %v6571_v34, %v6212_v52  ;;  %v6573_v28 = vld [vmem:[#allocation15_spill] sm:$0xff]  ;;  %v6575_v63 = vld [vmem:[#allocation16_spill] sm:$0xff]  ;;  %v2438_v12 = vmul.f32 %v6576_v31, %v6232_v35  ;;  %v2439_v37 = vmul.f32 %v6577_v50, %v6253_v56  ;;  %v6580_v1 = vld [vmem:[#allocation25_spill] sm:$0xff] }
 0x485   : > { %v2436_v42 = vmul.f32 %v6573_v28, %v6572_v61  ;;  %v2437_v40 = vmul.f32 %v6575_v63, %v6574_v5  ;;  %v6578_v22 = vld [vmem:[#allocation19_spill] sm:$0xff]  ;;  %v6579_v52 = vld [vmem:[#allocation20_spill] sm:$0xff]  ;;  %v6581_v35 = vld [vmem:[#allocation34_spill] sm:$0xff] }
 0x486   : > { %4187 = vmatmul.mubr.f32.gmra.mrb[36].mxu0 %v2383_v7  ;;  %v2440_v38 = vmul.f32 %v6578_v22, %v6259_v58  ;;  %v2441_v51 = vmul.f32 %v6579_v52, %v6242_v23  ;;  %v6589_v44 = vld [vmem:[#allocation29_spill] sm:$0xff]  ;;  %v6591_v5 = vld [vmem:[#allocation30_spill] sm:$0xff] }
 0x487   : > { %4627 = vmatpush3.bf16.msra.mxu0 %v4624_v43  ;;  %4189 = vmatprep.mubr.f32.mxu0 %v2384_v47  ;;  %v6592_v22 = vld [vmem:[#allocation33_spill] sm:$0xff] }
 0x488   : > { %4629 = vmatprep.subr.bf16.mxu0 %v4628_v26 }
 0x48a   : > { %4190 = vmatmul.mubr.f32.gmra.mrb[38].mxu0 %v2385_v62 }
 0x48b   : > { %4631 = vmatpush3.bf16.msra.mxu0 %v4628_v26  ;;  %4192 = vmatprep.mubr.f32.mxu0 %v2386_v30  ;;  %v6582_v26 = vld [vmem:[#allocation26_spill] sm:$0xff]  ;;  %v6584_v30 = vld [vmem:[#allocation27_spill] sm:$0xff] }
 0x48c   : > { %4633 = vmatprep.subr.bf16.mxu0 %v4632_v10 }
 0x48e   : > { %4193 = vmatmul.mubr.f32.gmra.mrb[40].mxu0 %v2387_v20  ;;  %v6585_v20 = vld [vmem:[#allocation36_spill] sm:$0xff] }
 0x48f   : > { %4635 = vmatpush3.bf16.msra.mxu0 %v4632_v10  ;;  %4195 = vmatprep.mubr.f32.mxu0 %v2388_v19 }
 0x490   : > { %4637 = vmatprep.subr.bf16.mxu0 %v4636_v53 }
 0x492   : > { %4196 = vmatmul.mubr.f32.gmra.mrb[42].mxu0 %v2389_v36 }
 0x493   : > { %4639 = vmatpush3.bf16.msra.mxu0 %v4636_v53  ;;  %4198 = vmatprep.mubr.f32.mxu0 %v2390_v27  ;;  %v6586_v27 = vld [vmem:[#allocation37_spill] sm:$0xff] }
 0x494   : > { %4641 = vmatprep.subr.bf16.mxu0 %v4640_v46 }
 0x496   : > { %4199 = vmatmul.mubr.f32.gmra.mrb[44].mxu0 %v2391_v57 }
 0x497   : > { %4643 = vmatpush3.bf16.msra.mxu0 %v4640_v46  ;;  %4201 = vmatprep.mubr.f32.mxu0 %v2392_v18 }
 0x498   : > { %4645 = vmatprep.subr.bf16.mxu0 %v4644_v16 }
 0x49a   : > { %4202 = vmatmul.mubr.f32.gmra.mrb[46].mxu0 %v2393_v13 }
 0x49b   : > { %4647 = vmatpush3.bf16.msra.mxu0 %v4644_v16  ;;  %4236 = vmatprep.mubr.f32.mxu0 %v2426_v17  ;;  %v6587_v16 = vld [vmem:[#allocation28_spill] sm:$0xff] }
 0x49e   : > { %4237 = vmatmul.mubr.f32.vlgmr.msra.gmra.mrb[32].mxu0 %v2427_v8 }
 0x49f   : > { %4239 = vmatprep.mubr.f32.mxu0 %v2428_v9 }
 0x4a2   : > { %4240 = vmatmul.mubr.f32.gmra.mrb[34].mxu0 %v2429_v6 }
 0x4a3   : > { %4242 = vmatprep.mubr.f32.mxu0 %v2430_v33  ;;  %v6588_v33 = vld [vmem:[#allocation38_spill] sm:$0xff] }
 0x4a6   : > { %4243 = vmatmul.mubr.f32.gmra.mrb[36].mxu0 %v2431_v3 }
 0x4a7   : > { %4245 = vmatprep.mubr.f32.mxu0 %v2432_v25 }
 0x4aa   : > { %4246 = vmatmul.mubr.f32.gmra.mrb[38].mxu0 %v2433_v21 }
 0x4ab   : > { %4248 = vmatprep.mubr.f32.mxu0 %v2434_v29 }
 0x4ae   : > { %4249 = vmatmul.mubr.f32.gmra.mrb[40].mxu0 %v2435_v41  ;;  %v6590_v41 = vld [vmem:[#allocation31_spill] sm:$0xff] }
 0x4af   : > { %4251 = vmatprep.mubr.f32.mxu0 %v2436_v42 }
 0x4b2   : > { %4252 = vmatmul.mubr.f32.gmra.mrb[42].mxu0 %v2437_v40 }
 0x4b3   : > { %4254 = vmatprep.mubr.f32.mxu0 %v2438_v12 }
 0x4b6   : > { %4255 = vmatmul.mubr.f32.gmra.mrb[44].mxu0 %v2439_v37 }
 0x4b7   : > { %4257 = vmatprep.mubr.f32.mxu0 %v2440_v38 }
 0x4ba   : > { %4258 = vmatmul.mubr.f32.gmra.mrb[46].mxu0 %v2441_v51 }
 0x571   : > { %v4238_v11 = vpop.f32.mrb[32].mxu0 }
 0x572   : > { %v2945_v43 = vadd.f32 %v4238_v11, %v6580_v1  ;;  %v2849_v45 = vpop.f32.mrb[33].mxu0  ;;  %v6593_v11 = vld [vmem:[#allocation32_spill] sm:$0xff] }
 0x573   : > { %v2944_v4 = vadd.f32 %v2849_v45, %v6581_v35 }
 0x574   : > { %v2961_v32 = vmax.f32 %v2945_v43, 0.0 }
 0x575   : > { %v2960_v7 = vmax.f32 %v2944_v4, 0.0  ;;  %v4241_v56 = vpop.f32.mrb[34].mxu0 }
 0x576   : > { %2977 = vst [vmem:[#allocation2 + $0x8] sm:$0xff] %v2961_v32  ;;  %v2947_v58 = vadd.f32 %v4241_v56, %v6582_v26  ;;  %v2859_v47 = vpop.f32.mrb[35].mxu0 }
 0x577   : > { %2976 = vst [vmem:[#allocation2] sm:$0xff] %v2960_v7  ;;  %v2946_v24 = vadd.f32 %v2859_v47, %v6583_v60  ;;  %v6594_v7 = vld [vmem:[#allocation9_spill] sm:$0xff]  ;;  %v6595_v47 = vld [vmem:[#allocation10_spill] sm:$0xff] }
 0x578   : > { %v2963_v23 = vmax.f32 %v2947_v58, 0.0 }
 0x579   : > { %v2962_v62 = vmax.f32 %v2946_v24, 0.0  ;;  %v4244_v10 = vpop.f32.mrb[36].mxu0 }
 0x57a   : > { %2979 = vst [vmem:[#allocation2 + $0x18] sm:$0xff] %v2963_v23  ;;  %v2949_v39 = vadd.f32 %v4244_v10, %v6584_v30  ;;  %v2869_v55 = vpop.f32.mrb[37].mxu0 }
 0x57b   : > { %2978 = vst [vmem:[#allocation2 + $0x10] sm:$0xff] %v2962_v62  ;;  %v2948_v53 = vadd.f32 %v2869_v55, %v6585_v20 }
 0x57c   : > { %v2965_v19 = vmax.f32 %v2949_v39, 0.0 }
 0x57d   : > { %v2964_v48 = vmax.f32 %v2948_v53, 0.0  ;;  %v4247_v0 = vpop.f32.mrb[38].mxu0 }
 0x57e   : > { %v2992_v36 = vld [vmem:[#allocation2] ss:$2 sm:$0xff]  ;;  %v3008_v46 = vld [vmem:[#allocation2 + $0x1] ss:$2 sm:$0xff]  ;;  %2981 = vst [vmem:[#allocation2 + $0x28] sm:$0xff] %v2965_v19  ;;  %v2951_v14 = vadd.f32 %v4247_v0, %v6586_v27  ;;  %v2879_v2 = vpop.f32.mrb[39].mxu0 }
 0x57f   : > { %v3023_v57 = vmax.f32 %v2992_v36, %v3008_v46  ;;  %2980 = vst [vmem:[#allocation2 + $0x20] sm:$0xff] %v2964_v48  ;;  %v2950_v18 = vadd.f32 %v2879_v2, %v6587_v16 }
 0x580   : > { %v2967_v13 = vmax.f32 %v2951_v14, 0.0 }
 0x581   : > { %3031 = vst [vmem:[%s6331_s16] sm:$0xff] %v3023_v57  ;;  %v2966_v17 = vmax.f32 %v2950_v18, 0.0  ;;  %v4250_v8 = vpop.f32.mrb[40].mxu0 }
 0x582   : > { %v2994_v9 = vld [vmem:[#allocation2 + $0x10] ss:$2 sm:$0xff]  ;;  %v3010_v6 = vld [vmem:[#allocation2 + $0x11] ss:$2 sm:$0xff]  ;;  %2983 = vst [vmem:[#allocation2 + $0x38] sm:$0xff] %v2967_v13  ;;  %v2953_v3 = vadd.f32 %v4250_v8, %v6588_v33  ;;  %v2889_v54 = vpop.f32.mrb[41].mxu0 }
 0x583   : > { %v3024_v25 = vmax.f32 %v2994_v9, %v3010_v6  ;;  %2982 = vst [vmem:[#allocation2 + $0x30] sm:$0xff] %v2966_v17  ;;  %v2952_v15 = vadd.f32 %v2889_v54, %v6589_v44 }
 0x584   : > { %v2969_v21 = vmax.f32 %v2953_v3, 0.0 }
 0x585   : > { %3032 = vst [vmem:[%s6331_s16 + $0x8] sm:$0xff] %v3024_v25  ;;  %v2968_v49 = vmax.f32 %v2952_v15, 0.0  ;;  %v4253_v59 = vpop.f32.mrb[42].mxu0 }
 0x586   : > { %v2996_v29 = vld [vmem:[#allocation2 + $0x20] ss:$2 sm:$0xff]  ;;  %v3012_v34 = vld [vmem:[#allocation2 + $0x21] ss:$2 sm:$0xff]  ;;  %2985 = vst [vmem:[#allocation2 + $0x48] sm:$0xff] %v2969_v21  ;;  %v2955_v61 = vadd.f32 %v4253_v59, %v6590_v41  ;;  %v2899_v28 = vpop.f32.mrb[43].mxu0 }
 0x587   : > { %v3025_v42 = vmax.f32 %v2996_v29, %v3012_v34  ;;  %2984 = vst [vmem:[#allocation2 + $0x40] sm:$0xff] %v2968_v49  ;;  %v2954_v63 = vadd.f32 %v2899_v28, %v6591_v5 }
 0x588   : > { %v2971_v40 = vmax.f32 %v2955_v61, 0.0 }
 0x589   : > { %3033 = vst [vmem:[%s6331_s16 + $0x10] sm:$0xff] %v3025_v42  ;;  %v2970_v31 = vmax.f32 %v2954_v63, 0.0  ;;  %v4256_v12 = vpop.f32.mrb[44].mxu0 }
 0x58a   : > { %v2998_v50 = vld [vmem:[#allocation2 + $0x30] ss:$2 sm:$0xff]  ;;  %v3014_v37 = vld [vmem:[#allocation2 + $0x31] ss:$2 sm:$0xff]  ;;  %2987 = vst [vmem:[#allocation2 + $0x58] sm:$0xff] %v2971_v40  ;;  %v2957_v38 = vadd.f32 %v4256_v12, %v6592_v22  ;;  %v2909_v52 = vpop.f32.mrb[45].mxu0 }
 0x58b   : > { %v3026_v51 = vmax.f32 %v2998_v50, %v3014_v37  ;;  %2986 = vst [vmem:[#allocation2 + $0x50] sm:$0xff] %v2970_v31  ;;  %v2956_v1 = vadd.f32 %v2909_v52, %v6593_v11 }
 0x58c   : > { %v2973_v43 = vmax.f32 %v2957_v38, 0.0 }
 0x58d   : > { %3034 = vst [vmem:[%s6331_s16 + $0x18] sm:$0xff] %v3026_v51  ;;  %v2972_v45 = vmax.f32 %v2956_v1, 0.0  ;;  %v4259_v35 = vpop.f32.mrb[46].mxu0 }
 0x58e   : > { %v3000_v4 = vld [vmem:[#allocation2 + $0x40] ss:$2 sm:$0xff]  ;;  %v3016_v32 = vld [vmem:[#allocation2 + $0x41] ss:$2 sm:$0xff]  ;;  %2989 = vst [vmem:[#allocation2 + $0x68] sm:$0xff] %v2973_v43  ;;  %v2959_v56 = vadd.f32 %v4259_v35, %v6594_v7  ;;  %v2919_v26 = vpop.f32.mrb[47].mxu0 }
 0x58f   : > { %v3027_v58 = vmax.f32 %v3000_v4, %v3016_v32  ;;  %2988 = vst [vmem:[#allocation2 + $0x60] sm:$0xff] %v2972_v45  ;;  %v2958_v60 = vadd.f32 %v2919_v26, %v6595_v47 }
 0x590   : > { %v2975_v24 = vmax.f32 %v2959_v56, 0.0 }
 0x591   : > { %3035 = vst [vmem:[%s6331_s16 + $0x20] sm:$0xff] %v3027_v58  ;;  %v2974_v23 = vmax.f32 %v2958_v60, 0.0 }
 0x592   : > { %v3002_v62 = vld [vmem:[#allocation2 + $0x50] ss:$2 sm:$0xff]  ;;  %v3018_v10 = vld [vmem:[#allocation2 + $0x51] ss:$2 sm:$0xff]  ;;  %2991 = vst [vmem:[#allocation2 + $0x78] sm:$0xff] %v2975_v24 }
 0x593   : > { %v3028_v30 = vmax.f32 %v3002_v62, %v3018_v10  ;;  %2990 = vst [vmem:[#allocation2 + $0x70] sm:$0xff] %v2974_v23 }
 0x595   : > { %3036 = vst [vmem:[%s6331_s16 + $0x28] sm:$0xff] %v3028_v30 }
 0x596   : > { %v3004_v39 = vld [vmem:[#allocation2 + $0x60] ss:$2 sm:$0xff]  ;;  %v3020_v55 = vld [vmem:[#allocation2 + $0x61] ss:$2 sm:$0xff] }
 0x597   : > { %v3029_v20 = vmax.f32 %v3004_v39, %v3020_v55 }
 0x599   : > { %3037 = vst [vmem:[%s6331_s16 + $0x30] sm:$0xff] %v3029_v20 }
 0x59a   : > { %v3006_v53 = vld [vmem:[#allocation2 + $0x70] ss:$2 sm:$0xff]  ;;  %v3022_v19 = vld [vmem:[#allocation2 + $0x71] ss:$2 sm:$0xff] }
 0x59b   : > { %v3030_v48 = vmax.f32 %v3006_v53, %v3022_v19 }
 0x59d   : > { %3038 = vst [vmem:[%s6331_s16 + $0x38] sm:$0xff] %v3030_v48 }
 0x59e   : > { %4903 = shalt.err (!%p4900_p7)
}
 0x59f   : > { %s4904_s7 = scalar_lea.hbm %s6353_s6, 1024  ;;  %s4908_s13 = scalar_lea.hbm %s6406_s5, 2048 }
 0x5a0   : > { %p4905_p8 = scmp.ne.s32.totalorder %s6353_s6, %s4904_s7  ;;  %p4909_p1 = scmp.lt.u32.totalorder %s6353_s6, %s6406_s5 }
 0x5a1   : > { %p4910_p0 = scmp.lt.u32.totalorder %s4908_s13, %s4904_s7  ;;  %p4912_p6 = scmp.lt.u32.totalorder %s4904_s7, %s6353_s6 }
 0x5a2   : > { %p4906_p11 = pnand %p4905_p8, %p6596_p9 }
 0x5a3   : > { %p4911_p5 = por %p4910_p0, %p4909_p1 }
 0x5a4   : > { %p4907_p13 = pneg %p4906_p11 }
 0x5a5   : > { %p4913_p10 = por %p4912_p6, %p4911_p5 }
 0x5a7   : > { %p4914_p12 = pnand %p4913_p10, %p4907_p13 }
 0x5a9   : > { %4917 = shalt.err (!%p4914_p12)
}
 0x5aa   : > { %s4962_s16 = smov 128   ;;  %s4963_s17 = smov 8  }
 0x5ab   : > { %4780 = dma.vmem_to_hbm [thread:$0]  (%p6596_p9), %s6355_s23, 1024, %s6353_s6, %s6360_s9, %s4962_s16, %s4962_s16, %s4963_s17  }
 0x5ac PF: > { %p4792_p2 = scmp.ge.s32.totalorder %s4956_s21, 2  ;;  %s3068_s25 = sand.u32 1, %s4944_s18  }
 0x5ad   : > { %p6597_p3 = scmp.ne.s32.totalorder %s6466_s29, 0  ;;  %s3069_s26 = scalar_lea.sflag [#allocation5], %s3068_s25 }
 0x5af   : > { %p4787_p4 = pnand %p4792_p2, %p6597_p3 }
 0x5b1   : > { %4939 = dma.done.wait (!%p4787_p4), %s3069_s26, 1024  }
 0x5b2   : > { %4941 = vsyncadd (!%p4787_p4), %s3069_s26, 4294966272  ;;  %p16_p7 = scmp.ge.s32.totalorder %s5019_s24, 4   ;;  %s6598_s18 = smov %s4948_s19 }
 0x5b3   : > { %s6599_s19 = smov %s4952_s20  ;;  %s6600_s20 = smov %s5030_s27 }
 0x5b4   : > { %s6601_s21 = smov %s5019_s24  ;;  %18 = sbr.rel (!%p16_p7) target bundleno = 4 (0x4), region = 106 }
 0x5bb   :  { %3074 = vsyncpa [#allocation4], 1 }
 0x5bc   :  { %3076 = vsyncpa [#allocation4 + $0x1], 1 }
 0x5bd   :  { %3077 = vsyncpa [#allocation5], 1 }
 0x5be   :  { %3079 = vsyncpa [#allocation5 + $0x1], 1 }

</bundles_post_ra>
